<compile_context>
chip_gen: v7x
topology: tpu7x:2x2x1
jax: 0.10.0
libtpu: 0.0.40
codegen_flags: <defaults>
</compile_context>

<pallas_src>
import functools

import jax
import jax.numpy as jnp
import numpy as np
from jax.experimental import pallas as pl
from jax.experimental.pallas import tpu as pltpu


def _state_rnn_kernel(x_ref, wih_ref, whh_ref, b_ref, wlin_ref, blin_ref,
                      out_ref, h_ref, c_ref, hseq_ref,
                      *, hidden_size, chunk_len, compute_dtype):
    """One grid step == one (batch_block, T-timestep chunk) of the LSTM.

    h_ref / c_ref carry the recurrent state across time chunks (grid axis 1).
    hseq_ref stages the chunk's hidden states for the batched output Linear.
    """
    H = hidden_size
    T = chunk_len
    Bb = x_ref.shape[0]
    D = x_ref.shape[2]

    # Zero-init the recurrent state at the start of each batch block's sequence.
    @pl.when(pl.program_id(1) == 0)
    def _():
        h_ref[...] = jnp.zeros_like(h_ref)
        c_ref[...] = jnp.zeros_like(c_ref)

    # ---- hoisted input projection for the whole chunk: one MXU matmul
    #      (M = Bb*T instead of M = Bb per timestep).  Bias (b_ih + b_hh) fused.
    x2 = x_ref[...].reshape(Bb * T, D).astype(compute_dtype)
    gx = (jnp.dot(x2, wih_ref[...], preferred_element_type=jnp.float32)
          + b_ref[...]).reshape(Bb, T, 4 * H)          # f32, (Bb, T, 4H)

    h = h_ref[...]          # (Bb, H) f32 carry
    c = c_ref[...]          # (Bb, H) f32 carry
    whh = whh_ref[...]      # (H, 4H) compute_dtype, loaded once per chunk

    # ---- sequential recurrence over the chunk (fully unrolled, static indices).
    #      Only h @ W_hh^T + elementwise gate math stays on the sequential path.
    for t in range(T):
        gates = gx[:, t, :] + jnp.dot(h.astype(compute_dtype), whh,
                                      preferred_element_type=jnp.float32)
        # PyTorch gate order [i, f, g, o]
        i_g = jax.nn.sigmoid(gates[:, 0 * H:1 * H])
        f_g = jax.nn.sigmoid(gates[:, 1 * H:2 * H])
        g_g = jnp.tanh(gates[:, 2 * H:3 * H])
        o_g = jax.nn.sigmoid(gates[:, 3 * H:4 * H])
        c = f_g * c + i_g * g_g
        h = o_g * jnp.tanh(c)
        hseq_ref[:, t, :] = h

    h_ref[...] = h
    c_ref[...] = c

    # ---- hoisted output Linear: one batched matmul + single store per chunk.
    hseq = hseq_ref[...].reshape(Bb * T, H).astype(compute_dtype)
    out = (jnp.dot(hseq, wlin_ref[...], preferred_element_type=jnp.float32)
           + blin_ref[...])
    out_ref[...] = out.reshape(Bb, T, -1).astype(out_ref.dtype)


def state_rnn_pallas(x, params, *, chunk_len=None, block_batch=None,
                     compute_dtype=jnp.bfloat16):
    """x: (B, S, D) float32.  Returns (B, S, num_states) float32."""
    B, S, D = x.shape
    H = params["w_hh"].shape[1]          # (4H, H)
    NS = params["w_lin"].shape[0]        # (NS, H)

    if chunk_len is None:
        chunk_len = min(S, 8)            # keep the unrolled inner loop small
    if block_batch is None:
        block_batch = B
    assert S % chunk_len == 0, "seq length must be divisible by chunk_len"
    assert B % block_batch == 0, "batch must be divisible by block_batch"
    T, Bb = chunk_len, block_batch

    # Weight prep (matmul operands in bf16; biases stay f32 for f32 accumulation).
    wih_t = params["w_ih"].T.astype(compute_dtype)                    # (D, 4H)
    whh_t = params["w_hh"].T.astype(compute_dtype)                    # (H, 4H)
    b = (params["b_ih"] + params["b_hh"]).astype(jnp.float32).reshape(1, 4 * H)
    wlin_t = params["w_lin"].T.astype(compute_dtype)                  # (H, NS)
    blin = params["b_lin"].astype(jnp.float32).reshape(1, NS)

    kernel = functools.partial(_state_rnn_kernel, hidden_size=H,
                               chunk_len=T, compute_dtype=compute_dtype)

    return pl.pallas_call(
        kernel,
        out_shape=jax.ShapeDtypeStruct((B, S, NS), jnp.float32),
        grid_spec=pltpu.PrefetchScalarGridSpec(
            num_scalar_prefetch=0,
            grid=(B // Bb, S // T),                    # (batch blocks, time chunks)
            in_specs=[
                pl.BlockSpec((Bb, T, D), lambda bi, ti: (bi, ti, 0)),   # x chunk
                pl.BlockSpec((D, 4 * H), lambda bi, ti: (0, 0)),        # W_ih^T
                pl.BlockSpec((H, 4 * H), lambda bi, ti: (0, 0)),        # W_hh^T
                pl.BlockSpec((1, 4 * H), lambda bi, ti: (0, 0)),        # fused bias
                pl.BlockSpec((H, NS), lambda bi, ti: (0, 0)),           # W_lin^T
                pl.BlockSpec((1, NS), lambda bi, ti: (0, 0)),           # b_lin
            ],
            out_specs=pl.BlockSpec((Bb, T, NS), lambda bi, ti: (bi, ti, 0)),
            scratch_shapes=[
                pltpu.VMEM((Bb, H), jnp.float32),       # h carry
                pltpu.VMEM((Bb, H), jnp.float32),       # c carry
                pltpu.VMEM((Bb, T, H), jnp.float32),    # chunk hidden states
            ],
        ),
        compiler_params=pltpu.CompilerParams(
            # batch blocks are independent (v7x megacore can shard them);
            # the time-chunk axis carries the recurrence and stays sequential.
            dimension_semantics=("parallel", "arbitrary"),
        ),
    )(x, wih_t, whh_t, b, wlin_t, blin)


def state_rnn_reference(x, params):
    """Pure-JAX f32 reference matching nn.LSTM(batch_first=True) + nn.Linear."""
    B, S, D = x.shape
    H = params["w_hh"].shape[1]
    wih_t = params["w_ih"].T
    whh_t = params["w_hh"].T
    b = params["b_ih"] + params["b_hh"]

    def step(carry, x_t):
        h, c = carry
        gates = x_t @ wih_t + h @ whh_t + b
        i = jax.nn.sigmoid(gates[:, 0 * H:1 * H])
        f = jax.nn.sigmoid(gates[:, 1 * H:2 * H])
        g = jnp.tanh(gates[:, 2 * H:3 * H])
        o = jax.nn.sigmoid(gates[:, 3 * H:4 * H])
        c = f * c + i * g
        h = o * jnp.tanh(c)
        return (h, c), h

    h0 = jnp.zeros((B, H), jnp.float32)
    c0 = jnp.zeros((B, H), jnp.float32)
    _, hs = jax.lax.scan(step, (h0, c0), jnp.transpose(x, (1, 0, 2)))
    lstm_out = jnp.transpose(hs, (1, 0, 2))                 # (B, S, H)
    return lstm_out @ params["w_lin"].T + params["b_lin"]


def init_params(key, input_size, hidden_size, num_states):
    """Deterministic init matching PyTorch parameter shapes."""
    ks = jax.random.split(key, 6)
    bound = 1.0 / np.sqrt(hidden_size)
    u = lambda k, shape: jax.random.uniform(k, shape, jnp.float32, -bound, bound)
    return {
        "w_ih": u(ks[0], (4 * hidden_size, input_size)),   # weight_ih_l0
        "w_hh": u(ks[1], (4 * hidden_size, hidden_size)),  # weight_hh_l0
        "b_ih": u(ks[2], (4 * hidden_size,)),              # bias_ih_l0
        "b_hh": u(ks[3], (4 * hidden_size,)),              # bias_hh_l0
        "w_lin": u(ks[4], (num_states, hidden_size)),      # linear.weight
        "b_lin": u(ks[5], (num_states,)),                  # linear.bias
    }


if __name__ == "__main__":
    batch, seq, input_size = 2, 8, 16
    hidden_size, num_states = 32, 4

    key = jax.random.PRNGKey(0)
    k_x, k_p = jax.random.split(key)
    x = jax.random.normal(k_x, (batch, seq, input_size), jnp.float32)
    params = init_params(k_p, input_size, hidden_size, num_states)

    ref = jax.block_until_ready(state_rnn_reference(x, params))

    # f32 matmul path (tight check of the kernel math).
    out_f32 = jax.block_until_ready(
        state_rnn_pallas(x, params, compute_dtype=jnp.float32))
    np.testing.assert_allclose(np.asarray(out_f32), np.asarray(ref),
                               rtol=1e-2, atol=1e-2)

    # Default bf16 matmul path (f32 accumulation / f32 carries); looser tolerance.
    out = jax.block_until_ready(state_rnn_pallas(x, params))
    np.testing.assert_allclose(np.asarray(out), np.asarray(ref),
                               rtol=3e-2, atol=3e-2)

    assert out.shape == (batch, seq, num_states)
    print("KERNEL_OK")
</pallas_src>

<mosaic_0001>
module attributes {stable_mosaic.version = 11 : i64} {
  func.func @_state_rnn_kernel(%arg0: i32, %arg1: i32, %arg2: memref<2x8x16xf32, #tpu.memory_space<vmem>>, %arg3: memref<16x128xf32, #tpu.memory_space<vmem>>, %arg4: memref<32x128xf32, #tpu.memory_space<vmem>>, %arg5: memref<1x128xf32, #tpu.memory_space<vmem>>, %arg6: memref<32x4xf32, #tpu.memory_space<vmem>>, %arg7: memref<1x4xf32, #tpu.memory_space<vmem>>, %arg8: memref<2x8x4xf32, #tpu.memory_space<vmem>>, %arg9: memref<2x32xf32, #tpu.memory_space<vmem>>, %arg10: memref<2x32xf32, #tpu.memory_space<vmem>>, %arg11: memref<2x8x32xf32, #tpu.memory_space<vmem>>) attributes {dimension_semantics = [#tpu.dimension_semantics<parallel>, #tpu.dimension_semantics<arbitrary>], iteration_bounds = array<i64: 1, 1>, scalar_prefetch = 0 : i64, scratch_operands = 3 : i64, tpu.core_type = #tpu.core_type<tc>, window_params = [{transform_indices = @transform_0, window_bounds = array<i64: 2, 8, 16>}, {pipeline_mode = #tpu.pipeline_mode<synchronous>, transform_indices = @transform_1, window_bounds = array<i64: 16, 128>}, {pipeline_mode = #tpu.pipeline_mode<synchronous>, transform_indices = @transform_2, window_bounds = array<i64: 32, 128>}, {pipeline_mode = #tpu.pipeline_mode<synchronous>, transform_indices = @transform_3, window_bounds = array<i64: 1, 128>}, {pipeline_mode = #tpu.pipeline_mode<synchronous>, transform_indices = @transform_4, window_bounds = array<i64: 32, 4>}, {pipeline_mode = #tpu.pipeline_mode<synchronous>, transform_indices = @transform_5, window_bounds = array<i64: 1, 4>}, {transform_indices = @transform_6, window_bounds = array<i64: 2, 8, 4>}]} {
    %c0_i32 = arith.constant 0 : i32
    %0 = arith.cmpi eq, %arg1, %c0_i32 : i32
    %1 = arith.extui %0 : i1 to i32
    %c0_i32_0 = arith.constant 0 : i32
    %2 = arith.cmpi ne, %1, %c0_i32_0 : i32
    scf.if %2 {
      %cst_77 = arith.constant 0.000000e+00 : f32
      %281 = vector.broadcast %cst_77 : f32 to vector<2x32xf32>
      %c0_78 = arith.constant 0 : index
      %c0_79 = arith.constant 0 : index
      %282 = vector.load %arg9[%c0_78, %c0_79] : memref<2x32xf32, #tpu.memory_space<vmem>>, vector<2x32xf32>
      tpu.vector_store %arg9[%c0_78, %c0_79], %281 {strides = array<i32>} : memref<2x32xf32, #tpu.memory_space<vmem>>, vector<2x32xf32>,
      %cst_80 = arith.constant 0.000000e+00 : f32
      %283 = vector.broadcast %cst_80 : f32 to vector<2x32xf32>
      %c0_81 = arith.constant 0 : index
      %c0_82 = arith.constant 0 : index
      %284 = vector.load %arg10[%c0_81, %c0_82] : memref<2x32xf32, #tpu.memory_space<vmem>>, vector<2x32xf32>
      tpu.vector_store %arg10[%c0_81, %c0_82], %283 {strides = array<i32>} : memref<2x32xf32, #tpu.memory_space<vmem>>, vector<2x32xf32>,
    } else {
    }
    %c0 = arith.constant 0 : index
    %c0_1 = arith.constant 0 : index
    %c0_2 = arith.constant 0 : index
    %3 = vector.load %arg2[%c0, %c0_1, %c0_2] : memref<2x8x16xf32, #tpu.memory_space<vmem>>, vector<2x8x16xf32>
    %4 = vector.shape_cast %3 : vector<2x8x16xf32> to vector<16x16xf32>
    %c0_3 = arith.constant 0 : index
    %c0_4 = arith.constant 0 : index
    %5 = vector.load %arg3[%c0_3, %c0_4] : memref<16x128xf32, #tpu.memory_space<vmem>>, vector<16x128xf32>
    %cst = arith.constant dense<0.000000e+00> : vector<16x128xf32>
    %6 = tpu.matmul %4, %5, %cst {dimension_numbers = #tpu.dot_dimension_numbers<[1], [0], [0], [1], [0, 0, 1, 1], [], []>} : vector<16x16xf32>, vector<16x128xf32>, vector<16x128xf32> -> vector<16x128xf32>
    %c0_5 = arith.constant 0 : index
    %c0_6 = arith.constant 0 : index
    %7 = vector.load %arg5[%c0_5, %c0_6] : memref<1x128xf32, #tpu.memory_space<vmem>>, vector<1x128xf32>
    %8 = vector.broadcast %7 : vector<1x128xf32> to vector<16x128xf32>
    %9 = arith.addf %6, %8 : vector<16x128xf32>
    %10 = vector.shape_cast %9 : vector<16x128xf32> to vector<2x8x128xf32>
    %c0_7 = arith.constant 0 : index
    %c0_8 = arith.constant 0 : index
    %11 = vector.load %arg9[%c0_7, %c0_8] : memref<2x32xf32, #tpu.memory_space<vmem>>, vector<2x32xf32>
    %c0_9 = arith.constant 0 : index
    %c0_10 = arith.constant 0 : index
    %12 = vector.load %arg10[%c0_9, %c0_10] : memref<2x32xf32, #tpu.memory_space<vmem>>, vector<2x32xf32>
    %c0_11 = arith.constant 0 : index
    %c0_12 = arith.constant 0 : index
    %13 = vector.load %arg4[%c0_11, %c0_12] : memref<32x128xf32, #tpu.memory_space<vmem>>, vector<32x128xf32>
    %14 = vector.extract_strided_slice %10 {offsets = [0, 0, 0], sizes = [2, 1, 128], strides = [1, 1, 1]} : vector<2x8x128xf32> to vector<2x1x128xf32>
    %15 = vector.shape_cast %14 : vector<2x1x128xf32> to vector<2x128xf32>
    %cst_13 = arith.constant dense<0.000000e+00> : vector<2x128xf32>
    %16 = tpu.matmul %11, %13, %cst_13 {dimension_numbers = #tpu.dot_dimension_numbers<[1], [0], [0], [1], [0, 0, 1, 1], [], []>} : vector<2x32xf32>, vector<32x128xf32>, vector<2x128xf32> -> vector<2x128xf32>
    %17 = arith.addf %15, %16 : vector<2x128xf32>
    %18 = vector.extract_strided_slice %17 {offsets = [0, 0], sizes = [2, 32], strides = [1, 1]} : vector<2x128xf32> to vector<2x32xf32>
    %19 = arith.negf %18 : vector<2x32xf32>
    %20 = math.exp %19 : vector<2x32xf32>
    %cst_14 = arith.constant 1.000000e+00 : f32
    %21 = vector.broadcast %cst_14 : f32 to vector<2x32xf32>
    %22 = arith.addf %21, %20 : vector<2x32xf32>
    %23 = arith.divf %21, %22 : vector<2x32xf32>
    %24 = vector.extract_strided_slice %17 {offsets = [0, 32], sizes = [2, 32], strides = [1, 1]} : vector<2x128xf32> to vector<2x32xf32>
    %25 = arith.negf %24 : vector<2x32xf32>
    %26 = math.exp %25 : vector<2x32xf32>
    %cst_15 = arith.constant 1.000000e+00 : f32
    %27 = vector.broadcast %cst_15 : f32 to vector<2x32xf32>
    %28 = arith.addf %27, %26 : vector<2x32xf32>
    %29 = arith.divf %27, %28 : vector<2x32xf32>
    %30 = vector.extract_strided_slice %17 {offsets = [0, 64], sizes = [2, 32], strides = [1, 1]} : vector<2x128xf32> to vector<2x32xf32>
    %31 = math.tanh %30 : vector<2x32xf32>
    %32 = vector.extract_strided_slice %17 {offsets = [0, 96], sizes = [2, 32], strides = [1, 1]} : vector<2x128xf32> to vector<2x32xf32>
    %33 = arith.negf %32 : vector<2x32xf32>
    %34 = math.exp %33 : vector<2x32xf32>
    %cst_16 = arith.constant 1.000000e+00 : f32
    %35 = vector.broadcast %cst_16 : f32 to vector<2x32xf32>
    %36 = arith.addf %35, %34 : vector<2x32xf32>
    %37 = arith.divf %35, %36 : vector<2x32xf32>
    %38 = arith.mulf %29, %12 : vector<2x32xf32>
    %39 = arith.mulf %23, %31 : vector<2x32xf32>
    %40 = arith.addf %38, %39 : vector<2x32xf32>
    %41 = math.tanh %40 : vector<2x32xf32>
    %42 = arith.mulf %37, %41 : vector<2x32xf32>
    %c0_17 = arith.constant 0 : index
    %c0_18 = arith.constant 0 : index
    %c0_19 = arith.constant 0 : index
    %43 = vector.load %arg11[%c0_17, %c0_18, %c0_19] : memref<2x8x32xf32, #tpu.memory_space<vmem>>, vector<2x1x32xf32>
    %44 = vector.shape_cast %43 : vector<2x1x32xf32> to vector<2x32xf32>
    %45 = vector.shape_cast %42 : vector<2x32xf32> to vector<2x1x32xf32>
    tpu.vector_store %arg11[%c0_17, %c0_18, %c0_19], %45 {strides = array<i32>} : memref<2x8x32xf32, #tpu.memory_space<vmem>>, vector<2x1x32xf32>,
    %46 = vector.extract_strided_slice %10 {offsets = [0, 1, 0], sizes = [2, 1, 128], strides = [1, 1, 1]} : vector<2x8x128xf32> to vector<2x1x128xf32>
    %47 = vector.shape_cast %46 : vector<2x1x128xf32> to vector<2x128xf32>
    %cst_20 = arith.constant dense<0.000000e+00> : vector<2x128xf32>
    %48 = tpu.matmul %42, %13, %cst_20 {dimension_numbers = #tpu.dot_dimension_numbers<[1], [0], [0], [1], [0, 0, 1, 1], [], []>} : vector<2x32xf32>, vector<32x128xf32>, vector<2x128xf32> -> vector<2x128xf32>
    %49 = arith.addf %47, %48 : vector<2x128xf32>
    %50 = vector.extract_strided_slice %49 {offsets = [0, 0], sizes = [2, 32], strides = [1, 1]} : vector<2x128xf32> to vector<2x32xf32>
    %51 = arith.negf %50 : vector<2x32xf32>
    %52 = math.exp %51 : vector<2x32xf32>
    %cst_21 = arith.constant 1.000000e+00 : f32
    %53 = vector.broadcast %cst_21 : f32 to vector<2x32xf32>
    %54 = arith.addf %53, %52 : vector<2x32xf32>
    %55 = arith.divf %53, %54 : vector<2x32xf32>
    %56 = vector.extract_strided_slice %49 {offsets = [0, 32], sizes = [2, 32], strides = [1, 1]} : vector<2x128xf32> to vector<2x32xf32>
    %57 = arith.negf %56 : vector<2x32xf32>
    %58 = math.exp %57 : vector<2x32xf32>
    %cst_22 = arith.constant 1.000000e+00 : f32
    %59 = vector.broadcast %cst_22 : f32 to vector<2x32xf32>
    %60 = arith.addf %59, %58 : vector<2x32xf32>
    %61 = arith.divf %59, %60 : vector<2x32xf32>
    %62 = vector.extract_strided_slice %49 {offsets = [0, 64], sizes = [2, 32], strides = [1, 1]} : vector<2x128xf32> to vector<2x32xf32>
    %63 = math.tanh %62 : vector<2x32xf32>
    %64 = vector.extract_strided_slice %49 {offsets = [0, 96], sizes = [2, 32], strides = [1, 1]} : vector<2x128xf32> to vector<2x32xf32>
    %65 = arith.negf %64 : vector<2x32xf32>
    %66 = math.exp %65 : vector<2x32xf32>
    %cst_23 = arith.constant 1.000000e+00 : f32
    %67 = vector.broadcast %cst_23 : f32 to vector<2x32xf32>
    %68 = arith.addf %67, %66 : vector<2x32xf32>
    %69 = arith.divf %67, %68 : vector<2x32xf32>
    %70 = arith.mulf %61, %40 : vector<2x32xf32>
    %71 = arith.mulf %55, %63 : vector<2x32xf32>
    %72 = arith.addf %70, %71 : vector<2x32xf32>
    %73 = math.tanh %72 : vector<2x32xf32>
    %74 = arith.mulf %69, %73 : vector<2x32xf32>
    %c0_24 = arith.constant 0 : index
    %c1 = arith.constant 1 : index
    %c0_25 = arith.constant 0 : index
    %75 = vector.load %arg11[%c0_24, %c1, %c0_25] : memref<2x8x32xf32, #tpu.memory_space<vmem>>, vector<2x1x32xf32>
    %76 = vector.shape_cast %75 : vector<2x1x32xf32> to vector<2x32xf32>
    %77 = vector.shape_cast %74 : vector<2x32xf32> to vector<2x1x32xf32>
    tpu.vector_store %arg11[%c0_24, %c1, %c0_25], %77 {strides = array<i32>} : memref<2x8x32xf32, #tpu.memory_space<vmem>>, vector<2x1x32xf32>,
    %78 = vector.extract_strided_slice %10 {offsets = [0, 2, 0], sizes = [2, 1, 128], strides = [1, 1, 1]} : vector<2x8x128xf32> to vector<2x1x128xf32>
    %79 = vector.shape_cast %78 : vector<2x1x128xf32> to vector<2x128xf32>
    %cst_26 = arith.constant dense<0.000000e+00> : vector<2x128xf32>
    %80 = tpu.matmul %74, %13, %cst_26 {dimension_numbers = #tpu.dot_dimension_numbers<[1], [0], [0], [1], [0, 0, 1, 1], [], []>} : vector<2x32xf32>, vector<32x128xf32>, vector<2x128xf32> -> vector<2x128xf32>
    %81 = arith.addf %79, %80 : vector<2x128xf32>
    %82 = vector.extract_strided_slice %81 {offsets = [0, 0], sizes = [2, 32], strides = [1, 1]} : vector<2x128xf32> to vector<2x32xf32>
    %83 = arith.negf %82 : vector<2x32xf32>
    %84 = math.exp %83 : vector<2x32xf32>
    %cst_27 = arith.constant 1.000000e+00 : f32
    %85 = vector.broadcast %cst_27 : f32 to vector<2x32xf32>
    %86 = arith.addf %85, %84 : vector<2x32xf32>
    %87 = arith.divf %85, %86 : vector<2x32xf32>
    %88 = vector.extract_strided_slice %81 {offsets = [0, 32], sizes = [2, 32], strides = [1, 1]} : vector<2x128xf32> to vector<2x32xf32>
    %89 = arith.negf %88 : vector<2x32xf32>
    %90 = math.exp %89 : vector<2x32xf32>
    %cst_28 = arith.constant 1.000000e+00 : f32
    %91 = vector.broadcast %cst_28 : f32 to vector<2x32xf32>
    %92 = arith.addf %91, %90 : vector<2x32xf32>
    %93 = arith.divf %91, %92 : vector<2x32xf32>
    %94 = vector.extract_strided_slice %81 {offsets = [0, 64], sizes = [2, 32], strides = [1, 1]} : vector<2x128xf32> to vector<2x32xf32>
    %95 = math.tanh %94 : vector<2x32xf32>
    %96 = vector.extract_strided_slice %81 {offsets = [0, 96], sizes = [2, 32], strides = [1, 1]} : vector<2x128xf32> to vector<2x32xf32>
    %97 = arith.negf %96 : vector<2x32xf32>
    %98 = math.exp %97 : vector<2x32xf32>
    %cst_29 = arith.constant 1.000000e+00 : f32
    %99 = vector.broadcast %cst_29 : f32 to vector<2x32xf32>
    %100 = arith.addf %99, %98 : vector<2x32xf32>
    %101 = arith.divf %99, %100 : vector<2x32xf32>
    %102 = arith.mulf %93, %72 : vector<2x32xf32>
    %103 = arith.mulf %87, %95 : vector<2x32xf32>
    %104 = arith.addf %102, %103 : vector<2x32xf32>
    %105 = math.tanh %104 : vector<2x32xf32>
    %106 = arith.mulf %101, %105 : vector<2x32xf32>
    %c0_30 = arith.constant 0 : index
    %c2 = arith.constant 2 : index
    %c0_31 = arith.constant 0 : index
    %107 = vector.load %arg11[%c0_30, %c2, %c0_31] : memref<2x8x32xf32, #tpu.memory_space<vmem>>, vector<2x1x32xf32>
    %108 = vector.shape_cast %107 : vector<2x1x32xf32> to vector<2x32xf32>
    %109 = vector.shape_cast %106 : vector<2x32xf32> to vector<2x1x32xf32>
    tpu.vector_store %arg11[%c0_30, %c2, %c0_31], %109 {strides = array<i32>} : memref<2x8x32xf32, #tpu.memory_space<vmem>>, vector<2x1x32xf32>,
    %110 = vector.extract_strided_slice %10 {offsets = [0, 3, 0], sizes = [2, 1, 128], strides = [1, 1, 1]} : vector<2x8x128xf32> to vector<2x1x128xf32>
    %111 = vector.shape_cast %110 : vector<2x1x128xf32> to vector<2x128xf32>
    %cst_32 = arith.constant dense<0.000000e+00> : vector<2x128xf32>
    %112 = tpu.matmul %106, %13, %cst_32 {dimension_numbers = #tpu.dot_dimension_numbers<[1], [0], [0], [1], [0, 0, 1, 1], [], []>} : vector<2x32xf32>, vector<32x128xf32>, vector<2x128xf32> -> vector<2x128xf32>
    %113 = arith.addf %111, %112 : vector<2x128xf32>
    %114 = vector.extract_strided_slice %113 {offsets = [0, 0], sizes = [2, 32], strides = [1, 1]} : vector<2x128xf32> to vector<2x32xf32>
    %115 = arith.negf %114 : vector<2x32xf32>
    %116 = math.exp %115 : vector<2x32xf32>
    %cst_33 = arith.constant 1.000000e+00 : f32
    %117 = vector.broadcast %cst_33 : f32 to vector<2x32xf32>
    %118 = arith.addf %117, %116 : vector<2x32xf32>
    %119 = arith.divf %117, %118 : vector<2x32xf32>
    %120 = vector.extract_strided_slice %113 {offsets = [0, 32], sizes = [2, 32], strides = [1, 1]} : vector<2x128xf32> to vector<2x32xf32>
    %121 = arith.negf %120 : vector<2x32xf32>
    %122 = math.exp %121 : vector<2x32xf32>
    %cst_34 = arith.constant 1.000000e+00 : f32
    %123 = vector.broadcast %cst_34 : f32 to vector<2x32xf32>
    %124 = arith.addf %123, %122 : vector<2x32xf32>
    %125 = arith.divf %123, %124 : vector<2x32xf32>
    %126 = vector.extract_strided_slice %113 {offsets = [0, 64], sizes = [2, 32], strides = [1, 1]} : vector<2x128xf32> to vector<2x32xf32>
    %127 = math.tanh %126 : vector<2x32xf32>
    %128 = vector.extract_strided_slice %113 {offsets = [0, 96], sizes = [2, 32], strides = [1, 1]} : vector<2x128xf32> to vector<2x32xf32>
    %129 = arith.negf %128 : vector<2x32xf32>
    %130 = math.exp %129 : vector<2x32xf32>
    %cst_35 = arith.constant 1.000000e+00 : f32
    %131 = vector.broadcast %cst_35 : f32 to vector<2x32xf32>
    %132 = arith.addf %131, %130 : vector<2x32xf32>
    %133 = arith.divf %131, %132 : vector<2x32xf32>
    %134 = arith.mulf %125, %104 : vector<2x32xf32>
    %135 = arith.mulf %119, %127 : vector<2x32xf32>
    %136 = arith.addf %134, %135 : vector<2x32xf32>
    %137 = math.tanh %136 : vector<2x32xf32>
    %138 = arith.mulf %133, %137 : vector<2x32xf32>
    %c0_36 = arith.constant 0 : index
    %c3 = arith.constant 3 : index
    %c0_37 = arith.constant 0 : index
    %139 = vector.load %arg11[%c0_36, %c3, %c0_37] : memref<2x8x32xf32, #tpu.memory_space<vmem>>, vector<2x1x32xf32>
    %140 = vector.shape_cast %139 : vector<2x1x32xf32> to vector<2x32xf32>
    %141 = vector.shape_cast %138 : vector<2x32xf32> to vector<2x1x32xf32>
    tpu.vector_store %arg11[%c0_36, %c3, %c0_37], %141 {strides = array<i32>} : memref<2x8x32xf32, #tpu.memory_space<vmem>>, vector<2x1x32xf32>,
    %142 = vector.extract_strided_slice %10 {offsets = [0, 4, 0], sizes = [2, 1, 128], strides = [1, 1, 1]} : vector<2x8x128xf32> to vector<2x1x128xf32>
    %143 = vector.shape_cast %142 : vector<2x1x128xf32> to vector<2x128xf32>
    %cst_38 = arith.constant dense<0.000000e+00> : vector<2x128xf32>
    %144 = tpu.matmul %138, %13, %cst_38 {dimension_numbers = #tpu.dot_dimension_numbers<[1], [0], [0], [1], [0, 0, 1, 1], [], []>} : vector<2x32xf32>, vector<32x128xf32>, vector<2x128xf32> -> vector<2x128xf32>
    %145 = arith.addf %143, %144 : vector<2x128xf32>
    %146 = vector.extract_strided_slice %145 {offsets = [0, 0], sizes = [2, 32], strides = [1, 1]} : vector<2x128xf32> to vector<2x32xf32>
    %147 = arith.negf %146 : vector<2x32xf32>
    %148 = math.exp %147 : vector<2x32xf32>
    %cst_39 = arith.constant 1.000000e+00 : f32
    %149 = vector.broadcast %cst_39 : f32 to vector<2x32xf32>
    %150 = arith.addf %149, %148 : vector<2x32xf32>
    %151 = arith.divf %149, %150 : vector<2x32xf32>
    %152 = vector.extract_strided_slice %145 {offsets = [0, 32], sizes = [2, 32], strides = [1, 1]} : vector<2x128xf32> to vector<2x32xf32>
    %153 = arith.negf %152 : vector<2x32xf32>
    %154 = math.exp %153 : vector<2x32xf32>
    %cst_40 = arith.constant 1.000000e+00 : f32
    %155 = vector.broadcast %cst_40 : f32 to vector<2x32xf32>
    %156 = arith.addf %155, %154 : vector<2x32xf32>
    %157 = arith.divf %155, %156 : vector<2x32xf32>
    %158 = vector.extract_strided_slice %145 {offsets = [0, 64], sizes = [2, 32], strides = [1, 1]} : vector<2x128xf32> to vector<2x32xf32>
    %159 = math.tanh %158 : vector<2x32xf32>
    %160 = vector.extract_strided_slice %145 {offsets = [0, 96], sizes = [2, 32], strides = [1, 1]} : vector<2x128xf32> to vector<2x32xf32>
    %161 = arith.negf %160 : vector<2x32xf32>
    %162 = math.exp %161 : vector<2x32xf32>
    %cst_41 = arith.constant 1.000000e+00 : f32
    %163 = vector.broadcast %cst_41 : f32 to vector<2x32xf32>
    %164 = arith.addf %163, %162 : vector<2x32xf32>
    %165 = arith.divf %163, %164 : vector<2x32xf32>
    %166 = arith.mulf %157, %136 : vector<2x32xf32>
    %167 = arith.mulf %151, %159 : vector<2x32xf32>
    %168 = arith.addf %166, %167 : vector<2x32xf32>
    %169 = math.tanh %168 : vector<2x32xf32>
    %170 = arith.mulf %165, %169 : vector<2x32xf32>
    %c0_42 = arith.constant 0 : index
    %c4 = arith.constant 4 : index
    %c0_43 = arith.constant 0 : index
    %171 = vector.load %arg11[%c0_42, %c4, %c0_43] : memref<2x8x32xf32, #tpu.memory_space<vmem>>, vector<2x1x32xf32>
    %172 = vector.shape_cast %171 : vector<2x1x32xf32> to vector<2x32xf32>
    %173 = vector.shape_cast %170 : vector<2x32xf32> to vector<2x1x32xf32>
    tpu.vector_store %arg11[%c0_42, %c4, %c0_43], %173 {strides = array<i32>} : memref<2x8x32xf32, #tpu.memory_space<vmem>>, vector<2x1x32xf32>,
    %174 = vector.extract_strided_slice %10 {offsets = [0, 5, 0], sizes = [2, 1, 128], strides = [1, 1, 1]} : vector<2x8x128xf32> to vector<2x1x128xf32>
    %175 = vector.shape_cast %174 : vector<2x1x128xf32> to vector<2x128xf32>
    %cst_44 = arith.constant dense<0.000000e+00> : vector<2x128xf32>
    %176 = tpu.matmul %170, %13, %cst_44 {dimension_numbers = #tpu.dot_dimension_numbers<[1], [0], [0], [1], [0, 0, 1, 1], [], []>} : vector<2x32xf32>, vector<32x128xf32>, vector<2x128xf32> -> vector<2x128xf32>
    %177 = arith.addf %175, %176 : vector<2x128xf32>
    %178 = vector.extract_strided_slice %177 {offsets = [0, 0], sizes = [2, 32], strides = [1, 1]} : vector<2x128xf32> to vector<2x32xf32>
    %179 = arith.negf %178 : vector<2x32xf32>
    %180 = math.exp %179 : vector<2x32xf32>
    %cst_45 = arith.constant 1.000000e+00 : f32
    %181 = vector.broadcast %cst_45 : f32 to vector<2x32xf32>
    %182 = arith.addf %181, %180 : vector<2x32xf32>
    %183 = arith.divf %181, %182 : vector<2x32xf32>
    %184 = vector.extract_strided_slice %177 {offsets = [0, 32], sizes = [2, 32], strides = [1, 1]} : vector<2x128xf32> to vector<2x32xf32>
    %185 = arith.negf %184 : vector<2x32xf32>
    %186 = math.exp %185 : vector<2x32xf32>
    %cst_46 = arith.constant 1.000000e+00 : f32
    %187 = vector.broadcast %cst_46 : f32 to vector<2x32xf32>
    %188 = arith.addf %187, %186 : vector<2x32xf32>
    %189 = arith.divf %187, %188 : vector<2x32xf32>
    %190 = vector.extract_strided_slice %177 {offsets = [0, 64], sizes = [2, 32], strides = [1, 1]} : vector<2x128xf32> to vector<2x32xf32>
    %191 = math.tanh %190 : vector<2x32xf32>
    %192 = vector.extract_strided_slice %177 {offsets = [0, 96], sizes = [2, 32], strides = [1, 1]} : vector<2x128xf32> to vector<2x32xf32>
    %193 = arith.negf %192 : vector<2x32xf32>
    %194 = math.exp %193 : vector<2x32xf32>
    %cst_47 = arith.constant 1.000000e+00 : f32
    %195 = vector.broadcast %cst_47 : f32 to vector<2x32xf32>
    %196 = arith.addf %195, %194 : vector<2x32xf32>
    %197 = arith.divf %195, %196 : vector<2x32xf32>
    %198 = arith.mulf %189, %168 : vector<2x32xf32>
    %199 = arith.mulf %183, %191 : vector<2x32xf32>
    %200 = arith.addf %198, %199 : vector<2x32xf32>
    %201 = math.tanh %200 : vector<2x32xf32>
    %202 = arith.mulf %197, %201 : vector<2x32xf32>
    %c0_48 = arith.constant 0 : index
    %c5 = arith.constant 5 : index
    %c0_49 = arith.constant 0 : index
    %203 = vector.load %arg11[%c0_48, %c5, %c0_49] : memref<2x8x32xf32, #tpu.memory_space<vmem>>, vector<2x1x32xf32>
    %204 = vector.shape_cast %203 : vector<2x1x32xf32> to vector<2x32xf32>
    %205 = vector.shape_cast %202 : vector<2x32xf32> to vector<2x1x32xf32>
    tpu.vector_store %arg11[%c0_48, %c5, %c0_49], %205 {strides = array<i32>} : memref<2x8x32xf32, #tpu.memory_space<vmem>>, vector<2x1x32xf32>,
    %206 = vector.extract_strided_slice %10 {offsets = [0, 6, 0], sizes = [2, 1, 128], strides = [1, 1, 1]} : vector<2x8x128xf32> to vector<2x1x128xf32>
    %207 = vector.shape_cast %206 : vector<2x1x128xf32> to vector<2x128xf32>
    %cst_50 = arith.constant dense<0.000000e+00> : vector<2x128xf32>
    %208 = tpu.matmul %202, %13, %cst_50 {dimension_numbers = #tpu.dot_dimension_numbers<[1], [0], [0], [1], [0, 0, 1, 1], [], []>} : vector<2x32xf32>, vector<32x128xf32>, vector<2x128xf32> -> vector<2x128xf32>
    %209 = arith.addf %207, %208 : vector<2x128xf32>
    %210 = vector.extract_strided_slice %209 {offsets = [0, 0], sizes = [2, 32], strides = [1, 1]} : vector<2x128xf32> to vector<2x32xf32>
    %211 = arith.negf %210 : vector<2x32xf32>
    %212 = math.exp %211 : vector<2x32xf32>
    %cst_51 = arith.constant 1.000000e+00 : f32
    %213 = vector.broadcast %cst_51 : f32 to vector<2x32xf32>
    %214 = arith.addf %213, %212 : vector<2x32xf32>
    %215 = arith.divf %213, %214 : vector<2x32xf32>
    %216 = vector.extract_strided_slice %209 {offsets = [0, 32], sizes = [2, 32], strides = [1, 1]} : vector<2x128xf32> to vector<2x32xf32>
    %217 = arith.negf %216 : vector<2x32xf32>
    %218 = math.exp %217 : vector<2x32xf32>
    %cst_52 = arith.constant 1.000000e+00 : f32
    %219 = vector.broadcast %cst_52 : f32 to vector<2x32xf32>
    %220 = arith.addf %219, %218 : vector<2x32xf32>
    %221 = arith.divf %219, %220 : vector<2x32xf32>
    %222 = vector.extract_strided_slice %209 {offsets = [0, 64], sizes = [2, 32], strides = [1, 1]} : vector<2x128xf32> to vector<2x32xf32>
    %223 = math.tanh %222 : vector<2x32xf32>
    %224 = vector.extract_strided_slice %209 {offsets = [0, 96], sizes = [2, 32], strides = [1, 1]} : vector<2x128xf32> to vector<2x32xf32>
    %225 = arith.negf %224 : vector<2x32xf32>
    %226 = math.exp %225 : vector<2x32xf32>
    %cst_53 = arith.constant 1.000000e+00 : f32
    %227 = vector.broadcast %cst_53 : f32 to vector<2x32xf32>
    %228 = arith.addf %227, %226 : vector<2x32xf32>
    %229 = arith.divf %227, %228 : vector<2x32xf32>
    %230 = arith.mulf %221, %200 : vector<2x32xf32>
    %231 = arith.mulf %215, %223 : vector<2x32xf32>
    %232 = arith.addf %230, %231 : vector<2x32xf32>
    %233 = math.tanh %232 : vector<2x32xf32>
    %234 = arith.mulf %229, %233 : vector<2x32xf32>
    %c0_54 = arith.constant 0 : index
    %c6 = arith.constant 6 : index
    %c0_55 = arith.constant 0 : index
    %235 = vector.load %arg11[%c0_54, %c6, %c0_55] : memref<2x8x32xf32, #tpu.memory_space<vmem>>, vector<2x1x32xf32>
    %236 = vector.shape_cast %235 : vector<2x1x32xf32> to vector<2x32xf32>
    %237 = vector.shape_cast %234 : vector<2x32xf32> to vector<2x1x32xf32>
    tpu.vector_store %arg11[%c0_54, %c6, %c0_55], %237 {strides = array<i32>} : memref<2x8x32xf32, #tpu.memory_space<vmem>>, vector<2x1x32xf32>,
    %238 = vector.extract_strided_slice %10 {offsets = [0, 7, 0], sizes = [2, 1, 128], strides = [1, 1, 1]} : vector<2x8x128xf32> to vector<2x1x128xf32>
    %239 = vector.shape_cast %238 : vector<2x1x128xf32> to vector<2x128xf32>
    %cst_56 = arith.constant dense<0.000000e+00> : vector<2x128xf32>
    %240 = tpu.matmul %234, %13, %cst_56 {dimension_numbers = #tpu.dot_dimension_numbers<[1], [0], [0], [1], [0, 0, 1, 1], [], []>} : vector<2x32xf32>, vector<32x128xf32>, vector<2x128xf32> -> vector<2x128xf32>
    %241 = arith.addf %239, %240 : vector<2x128xf32>
    %242 = vector.extract_strided_slice %241 {offsets = [0, 0], sizes = [2, 32], strides = [1, 1]} : vector<2x128xf32> to vector<2x32xf32>
    %243 = arith.negf %242 : vector<2x32xf32>
    %244 = math.exp %243 : vector<2x32xf32>
    %cst_57 = arith.constant 1.000000e+00 : f32
    %245 = vector.broadcast %cst_57 : f32 to vector<2x32xf32>
    %246 = arith.addf %245, %244 : vector<2x32xf32>
    %247 = arith.divf %245, %246 : vector<2x32xf32>
    %248 = vector.extract_strided_slice %241 {offsets = [0, 32], sizes = [2, 32], strides = [1, 1]} : vector<2x128xf32> to vector<2x32xf32>
    %249 = arith.negf %248 : vector<2x32xf32>
    %250 = math.exp %249 : vector<2x32xf32>
    %cst_58 = arith.constant 1.000000e+00 : f32
    %251 = vector.broadcast %cst_58 : f32 to vector<2x32xf32>
    %252 = arith.addf %251, %250 : vector<2x32xf32>
    %253 = arith.divf %251, %252 : vector<2x32xf32>
    %254 = vector.extract_strided_slice %241 {offsets = [0, 64], sizes = [2, 32], strides = [1, 1]} : vector<2x128xf32> to vector<2x32xf32>
    %255 = math.tanh %254 : vector<2x32xf32>
    %256 = vector.extract_strided_slice %241 {offsets = [0, 96], sizes = [2, 32], strides = [1, 1]} : vector<2x128xf32> to vector<2x32xf32>
    %257 = arith.negf %256 : vector<2x32xf32>
    %258 = math.exp %257 : vector<2x32xf32>
    %cst_59 = arith.constant 1.000000e+00 : f32
    %259 = vector.broadcast %cst_59 : f32 to vector<2x32xf32>
    %260 = arith.addf %259, %258 : vector<2x32xf32>
    %261 = arith.divf %259, %260 : vector<2x32xf32>
    %262 = arith.mulf %253, %232 : vector<2x32xf32>
    %263 = arith.mulf %247, %255 : vector<2x32xf32>
    %264 = arith.addf %262, %263 : vector<2x32xf32>
    %265 = math.tanh %264 : vector<2x32xf32>
    %266 = arith.mulf %261, %265 : vector<2x32xf32>
    %c0_60 = arith.constant 0 : index
    %c7 = arith.constant 7 : index
    %c0_61 = arith.constant 0 : index
    %267 = vector.load %arg11[%c0_60, %c7, %c0_61] : memref<2x8x32xf32, #tpu.memory_space<vmem>>, vector<2x1x32xf32>
    %268 = vector.shape_cast %267 : vector<2x1x32xf32> to vector<2x32xf32>
    %269 = vector.shape_cast %266 : vector<2x32xf32> to vector<2x1x32xf32>
    tpu.vector_store %arg11[%c0_60, %c7, %c0_61], %269 {strides = array<i32>} : memref<2x8x32xf32, #tpu.memory_space<vmem>>, vector<2x1x32xf32>,
    %c0_62 = arith.constant 0 : index
    %c0_63 = arith.constant 0 : index
    %270 = vector.load %arg9[%c0_62, %c0_63] : memref<2x32xf32, #tpu.memory_space<vmem>>, vector<2x32xf32>
    tpu.vector_store %arg9[%c0_62, %c0_63], %266 {strides = array<i32>} : memref<2x32xf32, #tpu.memory_space<vmem>>, vector<2x32xf32>,
    %c0_64 = arith.constant 0 : index
    %c0_65 = arith.constant 0 : index
    %271 = vector.load %arg10[%c0_64, %c0_65] : memref<2x32xf32, #tpu.memory_space<vmem>>, vector<2x32xf32>
    tpu.vector_store %arg10[%c0_64, %c0_65], %264 {strides = array<i32>} : memref<2x32xf32, #tpu.memory_space<vmem>>, vector<2x32xf32>,
    %c0_66 = arith.constant 0 : index
    %c0_67 = arith.constant 0 : index
    %c0_68 = arith.constant 0 : index
    %272 = vector.load %arg11[%c0_66, %c0_67, %c0_68] : memref<2x8x32xf32, #tpu.memory_space<vmem>>, vector<2x8x32xf32>
    %273 = vector.shape_cast %272 : vector<2x8x32xf32> to vector<16x32xf32>
    %c0_69 = arith.constant 0 : index
    %c0_70 = arith.constant 0 : index
    %274 = vector.load %arg6[%c0_69, %c0_70] : memref<32x4xf32, #tpu.memory_space<vmem>>, vector<32x4xf32>
    %cst_71 = arith.constant dense<0.000000e+00> : vector<16x4xf32>
    %275 = tpu.matmul %273, %274, %cst_71 {dimension_numbers = #tpu.dot_dimension_numbers<[1], [0], [0], [1], [0, 0, 1, 1], [], []>} : vector<16x32xf32>, vector<32x4xf32>, vector<16x4xf32> -> vector<16x4xf32>
    %c0_72 = arith.constant 0 : index
    %c0_73 = arith.constant 0 : index
    %276 = vector.load %arg7[%c0_72, %c0_73] : memref<1x4xf32, #tpu.memory_space<vmem>>, vector<1x4xf32>
    %277 = vector.broadcast %276 : vector<1x4xf32> to vector<16x4xf32>
    %278 = arith.addf %275, %277 : vector<16x4xf32>
    %279 = vector.shape_cast %278 : vector<16x4xf32> to vector<2x8x4xf32>
    %c0_74 = arith.constant 0 : index
    %c0_75 = arith.constant 0 : index
    %c0_76 = arith.constant 0 : index
    %280 = vector.load %arg8[%c0_74, %c0_75, %c0_76] : memref<2x8x4xf32, #tpu.memory_space<vmem>>, vector<2x8x4xf32>
    tpu.vector_store %arg8[%c0_74, %c0_75, %c0_76], %279 {strides = array<i32>} : memref<2x8x4xf32, #tpu.memory_space<vmem>>, vector<2x8x4xf32>,
    return
  }
  func.func @transform_0(%arg0: i32, %arg1: i32) -> (i32, i32, i32) {
    %c0_i32 = arith.constant 0 : i32
    %c0_i32_0 = arith.constant 0 : i32
    return %arg0, %arg1, %c0_i32 : i32, i32, i32
  }
  func.func @transform_1(%arg0: i32, %arg1: i32) -> (i32, i32) {
    %c0_i32 = arith.constant 0 : i32
    %c0_i32_0 = arith.constant 0 : i32
    %c0_i32_1 = arith.constant 0 : i32
    return %c0_i32, %c0_i32_0 : i32, i32
  }
  func.func @transform_2(%arg0: i32, %arg1: i32) -> (i32, i32) {
    %c0_i32 = arith.constant 0 : i32
    %c0_i32_0 = arith.constant 0 : i32
    %c0_i32_1 = arith.constant 0 : i32
    return %c0_i32, %c0_i32_0 : i32, i32
  }
  func.func @transform_3(%arg0: i32, %arg1: i32) -> (i32, i32) {
    %c0_i32 = arith.constant 0 : i32
    %c0_i32_0 = arith.constant 0 : i32
    %c0_i32_1 = arith.constant 0 : i32
    return %c0_i32, %c0_i32_0 : i32, i32
  }
  func.func @transform_4(%arg0: i32, %arg1: i32) -> (i32, i32) {
    %c0_i32 = arith.constant 0 : i32
    %c0_i32_0 = arith.constant 0 : i32
    %c0_i32_1 = arith.constant 0 : i32
    return %c0_i32, %c0_i32_0 : i32, i32
  }
  func.func @transform_5(%arg0: i32, %arg1: i32) -> (i32, i32) {
    %c0_i32 = arith.constant 0 : i32
    %c0_i32_0 = arith.constant 0 : i32
    %c0_i32_1 = arith.constant 0 : i32
    return %c0_i32, %c0_i32_0 : i32, i32
  }
  func.func @transform_6(%arg0: i32, %arg1: i32) -> (i32, i32, i32) {
    %c0_i32 = arith.constant 0 : i32
    %c0_i32_0 = arith.constant 0 : i32
    return %arg0, %arg1, %c0_i32 : i32, i32, i32
  }
}

</mosaic_0001>

<bundles_post_ra>
// kernel: tpu_custom_call.1
= control target key start
LH: loop header
LB: loop body
LE: loop exit
PB: predicated region body
PF: predicated region fallthrough
CT: control target
= control target key end

     0   :  { %11 = vsyncpa [#allocation6], 0  ;;  %s2237_s0 = inlined_call_operand.hbm [shape: f32[2,8,16], index: 0, kind: input, shape index: {}]   ;;  %s2238_s1 = inlined_call_operand.hbm [shape: f32[16,128], index: 1, kind: input, shape index: {}]   ;;  %s2239_s2 = inlined_call_operand.vmem [shape: f32[32,128], index: 2, kind: input, shape index: {}]   ;;  %s2240_s3 = inlined_call_operand.vmem [shape: f32[1,128], index: 3, kind: input, shape index: {}]   ;;  %s2241_s4 = inlined_call_operand.vmem [shape: f32[32,4], index: 4, kind: input, shape index: {}]   ;;  %s2242_s5 = inlined_call_operand.vmem [shape: f32[1,4], index: 5, kind: input, shape index: {}]   ;;  %s2243_s6 = inlined_call_operand.vmem [shape: f32[2,8,4], index: 6, kind: output, shape index: {}]  }
   0x1   :  { %12 = vsyncpa [#allocation8], 0  ;;  %s1897_s21 = smov [#allocation5]   ;;  %s1849_s25 = scalar_lea.hbm %s2237_s0, 256 }
   0x2   :  { %s18_s22 = sshll.u32 %s1897_s21, 4  ;;  %p1850_p0 = scmp.ne.s32.totalorder %s2237_s0, %s1849_s25  ;;  %s19_s22 = int_to_ptr.vmem [resolvable:$true] %s18_s22 }
   0x3   :  { %p1853_p1 = scmp.lt.u32.totalorder %s1849_s25, %s2237_s0 }
   0x5   :  { %p1855_p2 = pnand %p1853_p1, %p1850_p0 }
   0x7   :  { %1858 = shalt.err (!%p1855_p2)
}
   0x8   :  { %s1859_s30 = scalar_lea.vmem %s19_s22, 256  ;;  %p1864_p4 = scmp.lt.s32.totalorder %s19_s22, %s19_s22 }
   0x9   :  { %p1860_p3 = scmp.ne.s32.totalorder %s19_s22, %s1859_s30  ;;  %p1865_p5 = scmp.lt.s32.totalorder %s1859_s30, %s1859_s30 }
   0xb   :  { %p1866_p6 = por %p1865_p5, %p1864_p4 }
   0xd   :  { %p1867_p7 = pnand %p1866_p6, %p1860_p3 }
   0xf   :  { %1870 = shalt.err (!%p1867_p7)
}
  0x10   :  { %s1898_s7 = smov 128   ;;  %s1899_s8 = smov 8  }
  0x11   :  { %24 = dma.hbm_to_vmem [thread:$0]  %s2237_s0, 256, %s19_s22, [#allocation6], %s1898_s7, %s1898_s7, %s1899_s8  }
  0x12   :  { %s1900_s11 = smov [#allocation7]   ;;  %s1871_s15 = scalar_lea.hbm %s2238_s1, 256 }
  0x13   :  { %s30_s12 = sshll.u32 %s1900_s11, 4  ;;  %p1872_p8 = scmp.ne.s32.totalorder %s2238_s1, %s1871_s15  ;;  %s31_s12 = int_to_ptr.vmem [resolvable:$true] %s30_s12 }
  0x14   :  { %p1875_p9 = scmp.lt.u32.totalorder %s1871_s15, %s2238_s1 }
  0x16   :  { %p1877_p10 = pnand %p1875_p9, %p1872_p8 }
  0x18   :  { %1880 = shalt.err (!%p1877_p10)
}
  0x19   :  { %s1881_s20 = scalar_lea.vmem %s31_s12, 256  ;;  %p1886_p12 = scmp.lt.s32.totalorder %s31_s12, %s31_s12 }
  0x1a   :  { %p1882_p11 = scmp.ne.s32.totalorder %s31_s12, %s1881_s20  ;;  %p1887_p13 = scmp.lt.s32.totalorder %s1881_s20, %s1881_s20 }
  0x1c   :  { %p1888_p0 = por %p1887_p13, %p1886_p12 }
  0x1e   :  { %p1889_p1 = pnand %p1888_p0, %p1882_p11 }
  0x20   :  { %1892 = shalt.err (!%p1889_p1)
}
  0x21   :  { %36 = dma.hbm_to_vmem [thread:$0]  %s2238_s1, 256, %s31_s12, [#allocation8], %s1898_s7, %s1898_s7, %s1899_s8  }
  0x22   :  { %1893 = dma.done.wait [#allocation6], 256  }
  0x23   :  { %1894 = vsyncadd [#allocation6], 4294967040 }
  0x24   :  { %1895 = dma.done.wait [#allocation8], 256  }
  0x25   :  { %1896 = vsyncadd [#allocation8], 4294967040  ;;  %v1901_v0 = vmov 0.0|0.0   ;;  %vm1902_vm0 = vmmov 0   ;;  %v1903_v1 = vmov 0.0   ;;  %vm55_vm1 = vcmask 254976  }
  0x26   :  { %1655 = vmatprep.subr.bf16.mxu1 %v1901_v0  ;;  %1560 = vmatprep.mubr.msk.f32.mxu1 %vm1902_vm0, %v1903_v1  ;;  %56 = vst.msk [vmem:[#allocation2] sm:$0x3] %vm55_vm1, %v1903_v1  ;;  %57 = vst.msk [vmem:[#allocation3] sm:$0x3] %vm55_vm1, %v1903_v1  ;;  %vm69_vm2 = vcmask 130048   ;;  %v60_v2 = vld [vmem:[#allocation7] sm:$0xff] }
  0x27   :  { %v61_v3 = vld [vmem:[#allocation7 + $0x8] sm:$0xff]  ;;  %v153_v4 = vld [vmem:[%s2239_s2] sm:$0xff]  ;;  %v58_v7 = vld [vmem:[#allocation5] sm:$0xff]  ;;  %s1904_s29 = smov 32   ;;  %vm157_vm3 = vcmask 261120   ;;  %s1905_s7 = smov 64  }
  0x28   :  { %v1651_v5 = vpack.c.bf16 %v61_v3, %v60_v2  ;;  %v154_v6 = vld [vmem:[%s2239_s2 + $0x8] sm:$0xff]  ;;  %1549 = vmatprep.mubr.msk.f32.mxu0 %vm69_vm2, %v58_v7  ;;  %v155_v9 = vld [vmem:[%s2239_s2 + $0x10] sm:$0xff]  ;;  %v156_v10 = vld [vmem:[%s2239_s2 + $0x18] sm:$0xff]  ;;  %vm305_vm4 = vcmask 1041409   ;;  %vm301_vm5 = vcmask 253952   ;;  %vm449_vm6 = vcmask 254977  }
  0x29   :  { %v1977_v8 = vpack.c.bf16 %v154_v6, %v153_v4  ;;  %v59_v12 = vld [vmem:[#allocation5 + $0x8] sm:$0xff]  ;;  %v1987_v13 = vpack.c.bf16 %v156_v10, %v155_v9  ;;  %vm597_vm7 = vcmask 256002   ;;  %vm746_vm8 = vcmask 257027  }
  0x2a   :  { %1652 = vmatprep.subr.bf16.mxu0 %v1651_v5  ;;  %v1465_v18 = vld [vmem:[%s2240_s3] ss:$0 sm:$0xff]  ;;  %vm895_vm9 = vcmask 258052   ;;  %vm1044_vm10 = vcmask 259077   ;;  %vm1193_vm11 = vcmask 260102   ;;  %vm1342_vm12 = vcmask 261127  }
  0x2b   :  { %1657 = vmatpush3.bf16.msra.mxu1 %v1977_v8  ;;  %1654 = vmatpush3.bf16.msra.mxu0 %v1651_v5  ;;  %vm1456_vm13 = vcmask 31744  }
  0x2c   :  { %1658 = vmatprep.subr.bf16.mxu1 %v1901_v0  ;;  %1661 = vmatprep.subr.bf16.mxu0 %v1901_v0 }
  0x2d   :  { %v152_v11 = vld [vmem:[#allocation3] sm:$0x3]  ;;  %v151_v15 = vld [vmem:[#allocation2] sm:$0x3] }
  0x2e   :  { %v252_v14 = vrot.slane %v152_v11, 1  ;;  %1550 = vmatmul.mubr.msk.f32.vlgmr.msra.gmra.mrb[0].mxu0 %vm69_vm2, %v59_v12 }
  0x2f   :  { %1660 = vmatpush3.bf16.msra.mxu1 %v1987_v13  ;;  %1663 = vmatpush3.bf16.msra.mxu0 %v1977_v8 }
  0x30   :  { %255 = vrot.lane.b32.xlu1 %v252_v14, %s1904_s29  ;;  %1664 = vmatprep.subr.bf16.mxu0 %v1901_v0 }
  0x31   :  { %1571 = vmatprep.mubr.msk.f32.mxu0 %vm1902_vm0, %v1903_v1  ;;  %1667 = vmatprep.subr.bf16.mxu1 %v1901_v0 }
  0x32   :  { %1561 = vmatmul.mubr.msk.f32.vlgmr.msra.gmra.mrb[0].mxu1 %vm157_vm3, %v151_v15 }
  0x33   :  { %1666 = vmatpush3.bf16.msra.mxu0 %v1987_v13  ;;  %1669 = vmatpush3.bf16.msra.mxu1 %v1977_v8 }
  0x34   :  { %253 = vrot.lane.b32.xlu1 %v152_v11, %s1904_s29  ;;  %1670 = vmatprep.subr.bf16.mxu1 %v1901_v0 }
  0x35   :  { %1582 = vmatprep.mubr.msk.f32.mxu1 %vm1902_vm0, %v1903_v1  ;;  %1673 = vmatprep.subr.bf16.mxu0 %v1901_v0 }
  0x37   :  { %1672 = vmatpush3.bf16.msra.mxu1 %v1987_v13 }
  0x38   :  { %1679 = vmatprep.subr.bf16.mxu1 %v1901_v0 }
  0xa2   :  { %v256_v40 = vpop.permute.xlu1 %255 }
  0xa6   :  { %v254_v42 = vpop.permute.xlu1 %253 }
 0x101   :  { %v1551_v16 = vpop.f32.mrb[0].mxu0 }
 0x102   :  { %v142_v17 = vpop.f32.mrb[1].mxu0  ;;  %v2012_v19 = vadd.f32 %v1551_v16, %v1465_v18 }
 0x103   :  { %v2014_v23 = vadd.f32 %v1465_v18, %v142_v17 }
 0x105   :  { %v227_v20 = vpop.f32.mrb[0].mxu1 }
 0x106   :  { %v232_v21 = vrot.slane %v227_v20, 1  ;;  %v1562_v22 = vpop.f32.mrb[1].mxu1  ;;  %v235_v25 = vadd.f32 %v227_v20, %v2014_v23 }
 0x108   :  { %v236_v24 = vadd.f32 %v232_v21, %v2012_v19  ;;  %v1469_v29 = vmul.f32 -1.442695, %v235_v25 }
 0x10a   :  { %1721 = vtanh.f32 %v236_v24  ;;  %v1470_v28 = vmul.f32 -1.442695, %v236_v24 }
 0x10b   :  { %1723 = vtanh.f32 %v235_v25 }
 0x10c   :  { %1725 = vpow2.f32 %v1470_v28 }
 0x10d   :  { %1727 = vpow2.f32 %v1469_v29 }
 0x114   :  { %v1722_v26 = vpop.eup %1721 }
 0x115   :  { %265 = vrot.lane.b32.xlu0 %v1722_v26, %s1905_s7  ;;  %v1724_v27 = vpop.eup %1723 }
 0x116   :  { %v1726_v30 = vpop.eup %1725 }
 0x117   :  { %v244_v31 = vadd.f32 1.0, %v1726_v30  ;;  %v1728_v32 = vpop.eup %1727 }
 0x118   :  { %v243_v33 = vadd.f32 1.0, %v1728_v32 }
 0x119   :  { %263 = vrot.lane.b32.xlu0 %v1724_v27, %s1905_s7  ;;  %1729 = vrcp.f32 %v244_v31 }
 0x11a   :  { %1731 = vrcp.f32 %v243_v33 }
 0x123   :  { %v1730_v34 = vpop.eup %1729 }
 0x124   :  { %v1732_v37 = vpop.eup %1731  ;;  %v260_v41 = vmul.f32 %v1730_v34, %v256_v40 }
 0x125   :  { %v259_v45 = vmul.f32 %v1732_v37, %v254_v42 }
 0x187   :  { %v266_v35 = vpop.permute.xlu0 %265 }
 0x188   :  { %v270_v36 = vmul.f32 %v1730_v34, %v266_v35 }
 0x18a   :  { %275 = vrot.lane.b32.xlu0 %v270_v36, %s1904_s29 }
 0x18b   :  { %v264_v38 = vpop.permute.xlu0 %263 }
 0x18c   :  { %v269_v39 = vmul.f32 %v1732_v37, %v264_v38 }
 0x18e   :  { %273 = vrot.lane.b32.xlu1 %v269_v39, %s1904_s29 }
 0x1fc   :  { %v276_v43 = vpop.permute.xlu0 %275 }
 0x1fd   :  { %v280_v44 = vadd.f32 %v276_v43, %v260_v41 }
 0x1ff   :  { %1733 = vtanh.f32 %v280_v44  ;;  %v404_v16 = vrot.slane %v280_v44, 7 }
 0x200   :  { %v274_v46 = vpop.permute.xlu1 %273 }
 0x201   :  { %v279_v47 = vadd.f32 %v274_v46, %v259_v45 }
 0x203   :  { %1735 = vtanh.f32 %v279_v47  ;;  %v403_v18 = vrot.slane %v279_v47, 7 }
 0x209   :  { %v1734_v48 = vpop.eup %1733 }
 0x20a   :  { %287 = vrot.lane.b32.xlu0 %v1734_v48, %s1905_s7 }
 0x20d   :  { %v1736_v49 = vpop.eup %1735 }
 0x20e   :  { %285 = vrot.lane.b32.xlu1 %v1736_v49, %s1905_s7 }
 0x27c   :  { %v288_v50 = vpop.permute.xlu0 %287 }
 0x27d   :  { %v2024_v51 = vmul.f32 %v1730_v34, %v288_v50 }
 0x27f   :  { %v304_v53 = vrot.slane %v2024_v51, 7 }
 0x280   :  { %v286_v52 = vpop.permute.xlu1 %285 }
 0x281   :  { %v2027_v54 = vmul.f32 %v1732_v37, %v286_v52 }
 0x283   :  { %v306_v55 = vsel %vm305_vm4, %v304_v53, %v2027_v54 }
 0x284   :  { %307 = vrot.lane.b32.xlu0 %v306_v55, %s1904_s29 }
 0x2f6   :  { %v308_v56 = vpop.permute.xlu0 %307 }
 0x2f7   :  { %1572 = vmatmul.mubr.msk.f32.vlgmr.msra.gmra.mrb[2].mxu0 %vm157_vm3, %v308_v56 }
 0x2f8   :  { %1675 = vmatpush3.bf16.msra.mxu0 %v1977_v8  ;;  %1593 = vmatprep.mubr.msk.f32.mxu0 %vm1902_vm0, %v1903_v1 }
 0x2f9   :  { %1676 = vmatprep.subr.bf16.mxu0 %v1901_v0 }
 0x2fc   :  { %1678 = vmatpush3.bf16.msra.mxu0 %v1987_v13 }
 0x2fd   :  { %1685 = vmatprep.subr.bf16.mxu0 %v1901_v0 }
 0x3ca   :  { %v377_v57 = vpop.f32.mrb[2].mxu0 }
 0x3cb   :  { %v382_v58 = vrot.slane %v377_v57, 7  ;;  %v386_v59 = vadd.f32 %v377_v57, %v2012_v19  ;;  %v1573_v60 = vpop.f32.mrb[3].mxu0 }
 0x3cd   :  { %v385_v61 = vadd.f32 %v382_v58, %v2014_v23  ;;  %1737 = vtanh.f32 %v386_v59  ;;  %v1473_v2 = vmul.f32 -1.442695, %v386_v59 }
 0x3cf   :  { %1739 = vtanh.f32 %v385_v61  ;;  %v1472_v3 = vmul.f32 -1.442695, %v385_v61 }
 0x3d0   :  { %1741 = vpow2.f32 %v1473_v2 }
 0x3d1   :  { %1743 = vpow2.f32 %v1472_v3 }
 0x3d7   :  { %v1738_v62 = vpop.eup %1737 }
 0x3d8   :  { %413 = vrot.lane.b32.xlu0 %v1738_v62, %s1905_s7 }
 0x3d9   :  { %v1740_v63 = vpop.eup %1739 }
 0x3da   :  { %411 = vrot.lane.b32.xlu1 %v1740_v63, %s1905_s7  ;;  %v1742_v4 = vpop.eup %1741 }
 0x3db   :  { %v1744_v5 = vpop.eup %1743  ;;  %v394_v6 = vadd.f32 1.0, %v1742_v4 }
 0x3dc   :  { %v393_v7 = vadd.f32 1.0, %v1744_v5 }
 0x3dd   :  { %1745 = vrcp.f32 %v394_v6 }
 0x3de   :  { %1747 = vrcp.f32 %v393_v7 }
 0x3e7   :  { %v1746_v9 = vpop.eup %1745 }
 0x3e8   :  { %v1748_v12 = vpop.eup %1747  ;;  %v408_v17 = vmul.f32 %v1746_v9, %v404_v16 }
 0x3e9   :  { %v407_v22 = vmul.f32 %v1748_v12, %v403_v18 }
 0x44a   :  { %v414_v10 = vpop.permute.xlu0 %413 }
 0x44b   :  { %v418_v11 = vmul.f32 %v1746_v9, %v414_v10 }
 0x44c   :  { %v412_v14 = vpop.permute.xlu1 %411 }
 0x44d   :  { %423 = vrot.lane.b32.xlu0 %v418_v11, %s1904_s29  ;;  %v417_v15 = vmul.f32 %v1748_v12, %v412_v14 }
 0x44f   :  { %421 = vrot.lane.b32.xlu1 %v417_v15, %s1904_s29 }
 0x4bf   :  { %v424_v20 = vpop.permute.xlu0 %423 }
 0x4c0   :  { %v428_v21 = vadd.f32 %v424_v20, %v408_v17 }
 0x4c1   :  { %v422_v24 = vpop.permute.xlu1 %421 }
 0x4c2   :  { %1749 = vtanh.f32 %v428_v21  ;;  %v427_v25 = vadd.f32 %v422_v24, %v407_v22  ;;  %v552_v58 = vrot.slane %v428_v21, 7 }
 0x4c4   :  { %1751 = vtanh.f32 %v427_v25  ;;  %v551_v57 = vrot.slane %v427_v25, 7 }
 0x4cc   :  { %v1750_v26 = vpop.eup %1749 }
 0x4cd   :  { %435 = vrot.lane.b32.xlu0 %v1750_v26, %s1905_s7 }
 0x4ce   :  { %v1752_v27 = vpop.eup %1751 }
 0x4cf   :  { %433 = vrot.lane.b32.xlu1 %v1752_v27, %s1905_s7 }
 0x53f   :  { %v436_v28 = vpop.permute.xlu0 %435 }
 0x540   :  { %v2049_v31 = vmul.f32 %v1746_v9, %v436_v28 }
 0x541   :  { %v434_v29 = vpop.permute.xlu1 %433 }
 0x542   :  { %v2047_v30 = vmul.f32 %v1748_v12, %v434_v29 }
 0x544   :  { %v452_v32 = vrot.slane %v2047_v30, 1 }
 0x546   :  { %v453_v33 = vsel %vm305_vm4, %v2049_v31, %v452_v32 }
 0x547   :  { %454 = vrot.lane.b32.xlu1 %v453_v33, %s1904_s29 }
 0x5b9   :  { %v455_v34 = vpop.permute.xlu1 %454 }
 0x5ba   :  { %1583 = vmatmul.mubr.msk.f32.vlgmr.msra.gmra.mrb[2].mxu1 %vm157_vm3, %v455_v34 }
 0x5bb   :  { %1681 = vmatpush3.bf16.msra.mxu1 %v1977_v8  ;;  %1604 = vmatprep.mubr.msk.f32.mxu1 %vm1902_vm0, %v1903_v1 }
 0x5bc   :  { %1682 = vmatprep.subr.bf16.mxu1 %v1901_v0 }
 0x5bf   :  { %1684 = vmatpush3.bf16.msra.mxu1 %v1987_v13 }
 0x5c0   :  { %1691 = vmatprep.subr.bf16.mxu1 %v1901_v0 }
 0x68d   :  { %v524_v35 = vpop.f32.mrb[2].mxu1 }
 0x68e   :  { %v529_v36 = vrot.slane %v524_v35, 6  ;;  %v530_v37 = vrot.slane %v524_v35, 7  ;;  %v1584_v38 = vpop.f32.mrb[3].mxu1 }
 0x690   :  { %v533_v39 = vadd.f32 %v529_v36, %v2014_v23  ;;  %v534_v40 = vadd.f32 %v530_v37, %v2012_v19 }
 0x692   :  { %1753 = vtanh.f32 %v533_v39  ;;  %v1475_v43 = vmul.f32 -1.442695, %v533_v39  ;;  %v1476_v44 = vmul.f32 -1.442695, %v534_v40 }
 0x693   :  { %1755 = vtanh.f32 %v534_v40 }
 0x694   :  { %1757 = vpow2.f32 %v1475_v43 }
 0x695   :  { %1759 = vpow2.f32 %v1476_v44 }
 0x69c   :  { %v1754_v41 = vpop.eup %1753 }
 0x69d   :  { %v1756_v42 = vpop.eup %1755  ;;  %559 = vrot.lane.b32.xlu0 %v1754_v41, %s1905_s7 }
 0x69e   :  { %561 = vrot.lane.b32.xlu1 %v1756_v42, %s1905_s7  ;;  %v1758_v45 = vpop.eup %1757 }
 0x69f   :  { %v1760_v46 = vpop.eup %1759  ;;  %v541_v47 = vadd.f32 1.0, %v1758_v45 }
 0x6a0   :  { %v542_v48 = vadd.f32 1.0, %v1760_v46 }
 0x6a1   :  { %1761 = vrcp.f32 %v541_v47 }
 0x6a2   :  { %1763 = vrcp.f32 %v542_v48 }
 0x6ab   :  { %v1762_v49 = vpop.eup %1761 }
 0x6ac   :  { %v1764_v52 = vpop.eup %1763  ;;  %v555_v59 = vmul.f32 %v1762_v49, %v551_v57 }
 0x6ad   :  { %v556_v60 = vmul.f32 %v1764_v52, %v552_v58 }
 0x70f   :  { %v560_v50 = vpop.permute.xlu0 %559 }
 0x710   :  { %v562_v53 = vpop.permute.xlu1 %561  ;;  %v565_v55 = vmul.f32 %v1762_v49, %v560_v50 }
 0x711   :  { %v566_v56 = vmul.f32 %v1764_v52, %v562_v53 }
 0x712   :  { %569 = vrot.lane.b32.xlu0 %v565_v55, %s1904_s29 }
 0x713   :  { %571 = vrot.lane.b32.xlu1 %v566_v56, %s1904_s29 }
 0x784   :  { %v570_v61 = vpop.permute.xlu0 %569 }
 0x785   :  { %v572_v62 = vpop.permute.xlu1 %571  ;;  %v575_v63 = vadd.f32 %v570_v61, %v555_v59 }
 0x786   :  { %v576_v2 = vadd.f32 %v572_v62, %v556_v60 }
 0x787   :  { %1765 = vtanh.f32 %v575_v63  ;;  %v700_v39 = vrot.slane %v575_v63, 7 }
 0x788   :  { %1767 = vtanh.f32 %v576_v2  ;;  %v701_v40 = vrot.slane %v576_v2, 7 }
 0x791   :  { %v1766_v3 = vpop.eup %1765 }
 0x792   :  { %v1768_v4 = vpop.eup %1767  ;;  %581 = vrot.lane.b32.xlu0 %v1766_v3, %s1905_s7 }
 0x793   :  { %583 = vrot.lane.b32.xlu1 %v1768_v4, %s1905_s7 }
 0x804   :  { %v582_v5 = vpop.permute.xlu0 %581 }
 0x805   :  { %v584_v6 = vpop.permute.xlu1 %583  ;;  %v2070_v7 = vmul.f32 %v1762_v49, %v582_v5 }
 0x806   :  { %v2072_v9 = vmul.f32 %v1764_v52, %v584_v6 }
 0x807   :  { %v600_v10 = vrot.slane %v2070_v7, 2 }
 0x808   :  { %v601_v11 = vrot.slane %v2072_v9, 1 }
 0x80a   :  { %v602_v12 = vsel %vm305_vm4, %v601_v11, %v600_v10 }
 0x80b   :  { %603 = vrot.lane.b32.xlu0 %v602_v12, %s1904_s29 }
 0x87d   :  { %v604_v14 = vpop.permute.xlu0 %603 }
 0x87e   :  { %1594 = vmatmul.mubr.msk.f32.vlgmr.msra.gmra.mrb[4].mxu0 %vm157_vm3, %v604_v14 }
 0x87f   :  { %1687 = vmatpush3.bf16.msra.mxu0 %v1977_v8  ;;  %1615 = vmatprep.mubr.msk.f32.mxu0 %vm1902_vm0, %v1903_v1 }
 0x880   :  { %1688 = vmatprep.subr.bf16.mxu0 %v1901_v0 }
 0x883   :  { %1690 = vmatpush3.bf16.msra.mxu0 %v1987_v13 }
 0x884   :  { %1697 = vmatprep.subr.bf16.mxu0 %v1901_v0 }
 0x951   :  { %v673_v15 = vpop.f32.mrb[4].mxu0 }
 0x952   :  { %v678_v16 = vrot.slane %v673_v15, 5  ;;  %v679_v17 = vrot.slane %v673_v15, 6  ;;  %v1595_v18 = vpop.f32.mrb[5].mxu0 }
 0x954   :  { %v682_v20 = vadd.f32 %v678_v16, %v2014_v23  ;;  %v683_v21 = vadd.f32 %v679_v17, %v2012_v19 }
 0x956   :  { %1769 = vtanh.f32 %v682_v20  ;;  %v1478_v25 = vmul.f32 -1.442695, %v682_v20  ;;  %v1479_v26 = vmul.f32 -1.442695, %v683_v21 }
 0x957   :  { %1771 = vtanh.f32 %v683_v21 }
 0x958   :  { %1773 = vpow2.f32 %v1478_v25 }
 0x959   :  { %1775 = vpow2.f32 %v1479_v26 }
 0x960   :  { %v1770_v22 = vpop.eup %1769 }
 0x961   :  { %v1772_v24 = vpop.eup %1771  ;;  %708 = vrot.lane.b32.xlu1 %v1770_v22, %s1905_s7 }
 0x962   :  { %710 = vrot.lane.b32.xlu0 %v1772_v24, %s1905_s7  ;;  %v1774_v27 = vpop.eup %1773 }
 0x963   :  { %v1776_v28 = vpop.eup %1775  ;;  %v690_v29 = vadd.f32 1.0, %v1774_v27 }
 0x964   :  { %v691_v32 = vadd.f32 1.0, %v1776_v28 }
 0x965   :  { %1777 = vrcp.f32 %v690_v29 }
 0x966   :  { %1779 = vrcp.f32 %v691_v32 }
 0x96f   :  { %v1778_v33 = vpop.eup %1777 }
 0x970   :  { %v1780_v35 = vpop.eup %1779  ;;  %v704_v41 = vmul.f32 %v1778_v33, %v700_v39 }
 0x971   :  { %v705_v42 = vmul.f32 %v1780_v35, %v701_v40 }
 0x9d3   :  { %v709_v34 = vpop.permute.xlu1 %708 }
 0x9d4   :  { %v711_v36 = vpop.permute.xlu0 %710  ;;  %v714_v37 = vmul.f32 %v1778_v33, %v709_v34 }
 0x9d5   :  { %v715_v38 = vmul.f32 %v1780_v35, %v711_v36 }
 0x9d6   :  { %718 = vrot.lane.b32.xlu1 %v714_v37, %s1904_s29 }
 0x9d7   :  { %720 = vrot.lane.b32.xlu0 %v715_v38, %s1904_s29 }
 0xa48   :  { %v719_v43 = vpop.permute.xlu1 %718 }
 0xa49   :  { %v721_v44 = vpop.permute.xlu0 %720  ;;  %v724_v45 = vadd.f32 %v719_v43, %v704_v41 }
 0xa4a   :  { %v725_v46 = vadd.f32 %v721_v44, %v705_v42 }
 0xa4b   :  { %1781 = vtanh.f32 %v724_v45  ;;  %v849_v22 = vrot.slane %v724_v45, 7 }
 0xa4c   :  { %1783 = vtanh.f32 %v725_v46  ;;  %v850_v24 = vrot.slane %v725_v46, 7 }
 0xa55   :  { %v1782_v47 = vpop.eup %1781 }
 0xa56   :  { %v1784_v48 = vpop.eup %1783  ;;  %730 = vrot.lane.b32.xlu1 %v1782_v47, %s1905_s7 }
 0xa57   :  { %732 = vrot.lane.b32.xlu0 %v1784_v48, %s1905_s7 }
 0xac8   :  { %v731_v49 = vpop.permute.xlu1 %730 }
 0xac9   :  { %v733_v50 = vpop.permute.xlu0 %732  ;;  %v2093_v52 = vmul.f32 %v1778_v33, %v731_v49 }
 0xaca   :  { %v2095_v53 = vmul.f32 %v1780_v35, %v733_v50 }
 0xacb   :  { %v749_v55 = vrot.slane %v2093_v52, 3 }
 0xacc   :  { %v750_v56 = vrot.slane %v2095_v53, 2 }
 0xace   :  { %v751_v57 = vsel %vm305_vm4, %v750_v56, %v749_v55 }
 0xacf   :  { %752 = vrot.lane.b32.xlu1 %v751_v57, %s1904_s29 }
 0xb41   :  { %v753_v58 = vpop.permute.xlu1 %752 }
 0xb42   :  { %1605 = vmatmul.mubr.msk.f32.vlgmr.msra.gmra.mrb[4].mxu1 %vm157_vm3, %v753_v58 }
 0xb43   :  { %1693 = vmatpush3.bf16.msra.mxu1 %v1977_v8  ;;  %1626 = vmatprep.mubr.msk.f32.mxu1 %vm1902_vm0, %v1903_v1 }
 0xb44   :  { %1694 = vmatprep.subr.bf16.mxu1 %v1901_v0 }
 0xb47   :  { %1696 = vmatpush3.bf16.msra.mxu1 %v1987_v13 }
 0xc15   :  { %v822_v59 = vpop.f32.mrb[4].mxu1 }
 0xc16   :  { %v827_v60 = vrot.slane %v822_v59, 4  ;;  %v828_v61 = vrot.slane %v822_v59, 5  ;;  %v1606_v62 = vpop.f32.mrb[5].mxu1 }
 0xc18   :  { %v831_v63 = vadd.f32 %v827_v60, %v2014_v23  ;;  %v832_v2 = vadd.f32 %v828_v61, %v2012_v19 }
 0xc1a   :  { %1785 = vtanh.f32 %v831_v63  ;;  %v1481_v5 = vmul.f32 -1.442695, %v831_v63  ;;  %v1482_v6 = vmul.f32 -1.442695, %v832_v2 }
 0xc1b   :  { %1787 = vtanh.f32 %v832_v2 }
 0xc1c   :  { %1789 = vpow2.f32 %v1481_v5 }
 0xc1d   :  { %1791 = vpow2.f32 %v1482_v6 }
 0xc24   :  { %v1786_v3 = vpop.eup %1785 }
 0xc25   :  { %v1788_v4 = vpop.eup %1787  ;;  %857 = vrot.lane.b32.xlu0 %v1786_v3, %s1905_s7 }
 0xc26   :  { %859 = vrot.lane.b32.xlu1 %v1788_v4, %s1905_s7  ;;  %v1790_v10 = vpop.eup %1789 }
 0xc27   :  { %v1792_v11 = vpop.eup %1791  ;;  %v839_v12 = vadd.f32 1.0, %v1790_v10 }
 0xc28   :  { %v840_v14 = vadd.f32 1.0, %v1792_v11 }
 0xc29   :  { %1793 = vrcp.f32 %v839_v12 }
 0xc2a   :  { %1795 = vrcp.f32 %v840_v14 }
 0xc33   :  { %v1794_v15 = vpop.eup %1793 }
 0xc34   :  { %v1796_v17 = vpop.eup %1795  ;;  %v853_v25 = vmul.f32 %v1794_v15, %v849_v22 }
 0xc35   :  { %v854_v26 = vmul.f32 %v1796_v17, %v850_v24 }
 0xc97   :  { %v858_v16 = vpop.permute.xlu0 %857 }
 0xc98   :  { %v860_v18 = vpop.permute.xlu1 %859  ;;  %v863_v20 = vmul.f32 %v1794_v15, %v858_v16 }
 0xc99   :  { %v864_v21 = vmul.f32 %v1796_v17, %v860_v18 }
 0xc9a   :  { %867 = vrot.lane.b32.xlu0 %v863_v20, %s1904_s29 }
 0xc9b   :  { %869 = vrot.lane.b32.xlu1 %v864_v21, %s1904_s29 }
 0xd0c   :  { %v868_v27 = vpop.permute.xlu0 %867 }
 0xd0d   :  { %v870_v28 = vpop.permute.xlu1 %869  ;;  %v873_v29 = vadd.f32 %v868_v27, %v853_v25 }
 0xd0e   :  { %v874_v32 = vadd.f32 %v870_v28, %v854_v26 }
 0xd0f   :  { %1797 = vtanh.f32 %v873_v29  ;;  %v998_v63 = vrot.slane %v873_v29, 7 }
 0xd10   :  { %1799 = vtanh.f32 %v874_v32  ;;  %v999_v2 = vrot.slane %v874_v32, 7 }
 0xd19   :  { %v1798_v33 = vpop.eup %1797 }
 0xd1a   :  { %v1800_v34 = vpop.eup %1799  ;;  %879 = vrot.lane.b32.xlu0 %v1798_v33, %s1905_s7 }
 0xd1b   :  { %881 = vrot.lane.b32.xlu1 %v1800_v34, %s1905_s7 }
 0xd8c   :  { %v880_v35 = vpop.permute.xlu0 %879 }
 0xd8d   :  { %v882_v36 = vpop.permute.xlu1 %881  ;;  %v2115_v37 = vmul.f32 %v1794_v15, %v880_v35 }
 0xd8e   :  { %v2117_v38 = vmul.f32 %v1796_v17, %v882_v36 }
 0xd8f   :  { %v898_v39 = vrot.slane %v2115_v37, 4 }
 0xd90   :  { %v899_v40 = vrot.slane %v2117_v38, 3 }
 0xd92   :  { %v900_v41 = vsel %vm305_vm4, %v899_v40, %v898_v39 }
 0xd93   :  { %901 = vrot.lane.b32.xlu0 %v900_v41, %s1904_s29 }
 0xe05   :  { %v902_v42 = vpop.permute.xlu0 %901 }
 0xe06   :  { %1616 = vmatmul.mubr.msk.f32.vlgmr.msra.gmra.mrb[6].mxu0 %vm157_vm3, %v902_v42 }
 0xe07   :  { %1699 = vmatpush3.bf16.msra.mxu0 %v1977_v8  ;;  %1637 = vmatprep.mubr.msk.f32.mxu0 %vm1902_vm0, %v1903_v1 }
 0xe08   :  { %1700 = vmatprep.subr.bf16.mxu0 %v1901_v0 }
 0xe0b   :  { %1702 = vmatpush3.bf16.msra.mxu0 %v1987_v13 }
 0xed9   :  { %v971_v43 = vpop.f32.mrb[6].mxu0 }
 0xeda   :  { %v976_v44 = vrot.slane %v971_v43, 3  ;;  %v977_v45 = vrot.slane %v971_v43, 4  ;;  %v1617_v46 = vpop.f32.mrb[7].mxu0 }
 0xedc   :  { %v980_v47 = vadd.f32 %v976_v44, %v2014_v23  ;;  %v981_v48 = vadd.f32 %v977_v45, %v2012_v19 }
 0xede   :  { %1801 = vtanh.f32 %v980_v47  ;;  %v1484_v1 = vmul.f32 -1.442695, %v980_v47  ;;  %v1485_v0 = vmul.f32 -1.442695, %v981_v48 }
 0xedf   :  { %1803 = vtanh.f32 %v981_v48 }
 0xee0   :  { %1805 = vpow2.f32 %v1484_v1 }
 0xee1   :  { %1807 = vpow2.f32 %v1485_v0 }
 0xee8   :  { %v1802_v49 = vpop.eup %1801 }
 0xee9   :  { %v1804_v50 = vpop.eup %1803  ;;  %1006 = vrot.lane.b32.xlu1 %v1802_v49, %s1905_s7 }
 0xeea   :  { %1008 = vrot.lane.b32.xlu0 %v1804_v50, %s1905_s7  ;;  %v1806_v8 = vpop.eup %1805 }
 0xeeb   :  { %v1808_v13 = vpop.eup %1807  ;;  %v988_v55 = vadd.f32 1.0, %v1806_v8 }
 0xeec   :  { %v989_v56 = vadd.f32 1.0, %v1808_v13 }
 0xeed   :  { %1809 = vrcp.f32 %v988_v55 }
 0xeee   :  { %1811 = vrcp.f32 %v989_v56 }
 0xef7   :  { %v1810_v57 = vpop.eup %1809 }
 0xef8   :  { %v1812_v59 = vpop.eup %1811  ;;  %v1002_v3 = vmul.f32 %v1810_v57, %v998_v63 }
 0xef9   :  { %v1003_v4 = vmul.f32 %v1812_v59, %v999_v2 }
 0xf5b   :  { %v1007_v58 = vpop.permute.xlu1 %1006 }
 0xf5c   :  { %v1009_v60 = vpop.permute.xlu0 %1008  ;;  %v1012_v61 = vmul.f32 %v1810_v57, %v1007_v58 }
 0xf5d   :  { %v1013_v62 = vmul.f32 %v1812_v59, %v1009_v60 }
 0xf5e   :  { %1016 = vrot.lane.b32.xlu1 %v1012_v61, %s1904_s29 }
 0xf5f   :  { %1018 = vrot.lane.b32.xlu0 %v1013_v62, %s1904_s29 }
 0xfd0   :  { %v1017_v5 = vpop.permute.xlu1 %1016 }
 0xfd1   :  { %v1019_v6 = vpop.permute.xlu0 %1018  ;;  %v1022_v10 = vadd.f32 %v1017_v5, %v1002_v3 }
 0xfd2   :  { %v1023_v11 = vadd.f32 %v1019_v6, %v1003_v4 }
 0xfd3   :  { %1813 = vtanh.f32 %v1022_v10  ;;  %v1147_v49 = vrot.slane %v1022_v10, 7 }
 0xfd4   :  { %1815 = vtanh.f32 %v1023_v11  ;;  %v1148_v50 = vrot.slane %v1023_v11, 7 }
 0xfdd   :  { %v1814_v12 = vpop.eup %1813 }
 0xfde   :  { %v1816_v14 = vpop.eup %1815  ;;  %1028 = vrot.lane.b32.xlu1 %v1814_v12, %s1905_s7 }
 0xfdf   :  { %1030 = vrot.lane.b32.xlu0 %v1816_v14, %s1905_s7 }
0x1050   :  { %v1029_v15 = vpop.permute.xlu1 %1028 }
0x1051   :  { %v1031_v16 = vpop.permute.xlu0 %1030  ;;  %v2137_v17 = vmul.f32 %v1810_v57, %v1029_v15 }
0x1052   :  { %v2139_v18 = vmul.f32 %v1812_v59, %v1031_v16 }
0x1053   :  { %v1047_v20 = vrot.slane %v2137_v17, 5 }
0x1054   :  { %v1048_v21 = vrot.slane %v2139_v18, 4 }
0x1056   :  { %v1049_v22 = vsel %vm305_vm4, %v1048_v21, %v1047_v20 }
0x1057   :  { %1050 = vrot.lane.b32.xlu1 %v1049_v22, %s1904_s29 }
0x10c9   :  { %v1051_v24 = vpop.permute.xlu1 %1050 }
0x10ca   :  { %1627 = vmatmul.mubr.msk.f32.vlgmr.msra.gmra.mrb[6].mxu1 %vm157_vm3, %v1051_v24 }
0x119d   :  { %v1120_v25 = vpop.f32.mrb[6].mxu1 }
0x119e   :  { %v1125_v26 = vrot.slane %v1120_v25, 2  ;;  %v1126_v27 = vrot.slane %v1120_v25, 3  ;;  %v1628_v28 = vpop.f32.mrb[7].mxu1 }
0x11a0   :  { %v1129_v29 = vadd.f32 %v1125_v26, %v2014_v23  ;;  %v1130_v32 = vadd.f32 %v1126_v27, %v2012_v19 }
0x11a2   :  { %1817 = vtanh.f32 %v1129_v29  ;;  %v1487_v35 = vmul.f32 -1.442695, %v1129_v29  ;;  %v1488_v36 = vmul.f32 -1.442695, %v1130_v32 }
0x11a3   :  { %1819 = vtanh.f32 %v1130_v32 }
0x11a4   :  { %1821 = vpow2.f32 %v1487_v35 }
0x11a5   :  { %1823 = vpow2.f32 %v1488_v36 }
0x11ac   :  { %v1818_v33 = vpop.eup %1817 }
0x11ad   :  { %v1820_v34 = vpop.eup %1819  ;;  %1155 = vrot.lane.b32.xlu0 %v1818_v33, %s1905_s7 }
0x11ae   :  { %1157 = vrot.lane.b32.xlu1 %v1820_v34, %s1905_s7  ;;  %v1822_v39 = vpop.eup %1821 }
0x11af   :  { %v1824_v40 = vpop.eup %1823  ;;  %v1137_v41 = vadd.f32 1.0, %v1822_v39 }
0x11b0   :  { %v1138_v42 = vadd.f32 1.0, %v1824_v40 }
0x11b1   :  { %1825 = vrcp.f32 %v1137_v41 }
0x11b2   :  { %1827 = vrcp.f32 %v1138_v42 }
0x11bb   :  { %v1826_v43 = vpop.eup %1825 }
0x11bc   :  { %v1828_v45 = vpop.eup %1827  ;;  %v1151_v1 = vmul.f32 %v1826_v43, %v1147_v49 }
0x11bd   :  { %v1152_v0 = vmul.f32 %v1828_v45, %v1148_v50 }
0x121f   :  { %v1156_v44 = vpop.permute.xlu0 %1155 }
0x1220   :  { %v1158_v46 = vpop.permute.xlu1 %1157  ;;  %v1161_v47 = vmul.f32 %v1826_v43, %v1156_v44 }
0x1221   :  { %v1162_v48 = vmul.f32 %v1828_v45, %v1158_v46 }
0x1222   :  { %1165 = vrot.lane.b32.xlu0 %v1161_v47, %s1904_s29 }
0x1223   :  { %1167 = vrot.lane.b32.xlu1 %v1162_v48, %s1904_s29 }
0x1294   :  { %v1166_v8 = vpop.permute.xlu0 %1165 }
0x1295   :  { %v1168_v13 = vpop.permute.xlu1 %1167  ;;  %v1171_v55 = vadd.f32 %v1166_v8, %v1151_v1 }
0x1296   :  { %v1172_v56 = vadd.f32 %v1168_v13, %v1152_v0 }
0x1297   :  { %1829 = vtanh.f32 %v1171_v55  ;;  %v1296_v33 = vrot.slane %v1171_v55, 7 }
0x1298   :  { %1831 = vtanh.f32 %v1172_v56  ;;  %v1297_v34 = vrot.slane %v1172_v56, 7 }
0x12a1   :  { %v1830_v57 = vpop.eup %1829 }
0x12a2   :  { %v1832_v58 = vpop.eup %1831  ;;  %1177 = vrot.lane.b32.xlu0 %v1830_v57, %s1905_s7 }
0x12a3   :  { %1179 = vrot.lane.b32.xlu1 %v1832_v58, %s1905_s7 }
0x1314   :  { %v1178_v59 = vpop.permute.xlu0 %1177 }
0x1315   :  { %v1180_v60 = vpop.permute.xlu1 %1179  ;;  %v1183_v61 = vmul.f32 %v1826_v43, %v1178_v59 }
0x1316   :  { %v2154_v62 = vmul.f32 %v1828_v45, %v1180_v60 }
0x1317   :  { %v1196_v63 = vrot.slane %v1183_v61, 6 }
0x1318   :  { %v1197_v2 = vrot.slane %v2154_v62, 5 }
0x131a   :  { %v1198_v3 = vsel %vm305_vm4, %v1197_v2, %v1196_v63 }
0x131b   :  { %1199 = vrot.lane.b32.xlu0 %v1198_v3, %s1904_s29 }
0x138d   :  { %v1200_v4 = vpop.permute.xlu0 %1199 }
0x138e   :  { %1638 = vmatmul.mubr.msk.f32.vlgmr.msra.gmra.mrb[8].mxu0 %vm157_vm3, %v1200_v4  ;;  %v1492_v4 = vld [vmem:[%s2242_s5] ss:$0 sm:$0xff] }
0x1461   :  { %v1269_v5 = vpop.f32.mrb[8].mxu0 }
0x1462   :  { %v1274_v6 = vrot.slane %v1269_v5, 1  ;;  %v1275_v10 = vrot.slane %v1269_v5, 2  ;;  %v1639_v11 = vpop.f32.mrb[9].mxu0 }
0x1464   :  { %v1278_v12 = vadd.f32 %v1274_v6, %v2014_v23  ;;  %v1279_v14 = vadd.f32 %v1275_v10, %v2012_v19 }
0x1466   :  { %1833 = vtanh.f32 %v1278_v12  ;;  %v1490_v20 = vmul.f32 -1.442695, %v1278_v12  ;;  %v1491_v21 = vmul.f32 -1.442695, %v1279_v14 }
0x1467   :  { %1835 = vtanh.f32 %v1279_v14 }
0x1468   :  { %1837 = vpow2.f32 %v1490_v20 }
0x1469   :  { %1839 = vpow2.f32 %v1491_v21 }
0x1470   :  { %v1834_v15 = vpop.eup %1833 }
0x1471   :  { %v1836_v16 = vpop.eup %1835  ;;  %1304 = vrot.lane.b32.xlu1 %v1834_v15, %s1905_s7 }
0x1472   :  { %1306 = vrot.lane.b32.xlu0 %v1836_v16, %s1905_s7  ;;  %v1838_v22 = vpop.eup %1837 }
0x1473   :  { %v1840_v24 = vpop.eup %1839  ;;  %v1286_v25 = vadd.f32 1.0, %v1838_v22 }
0x1474   :  { %v1287_v26 = vadd.f32 1.0, %v1840_v24 }
0x1475   :  { %1841 = vrcp.f32 %v1286_v25 }
0x1476   :  { %1843 = vrcp.f32 %v1287_v26 }
0x147f   :  { %v1842_v23 = vpop.eup %1841 }
0x1480   :  { %v1844_v27 = vpop.eup %1843  ;;  %v1300_v35 = vmul.f32 %v1842_v23, %v1296_v33 }
0x1481   :  { %v1301_v36 = vmul.f32 %v1844_v27, %v1297_v34 }
0x14e3   :  { %v1305_v19 = vpop.permute.xlu1 %1304 }
0x14e4   :  { %v1307_v28 = vpop.permute.xlu0 %1306  ;;  %v1310_v29 = vmul.f32 %v1842_v23, %v1305_v19 }
0x14e5   :  { %v1311_v32 = vmul.f32 %v1844_v27, %v1307_v28 }
0x14e6   :  { %1314 = vrot.lane.b32.xlu1 %v1310_v29, %s1904_s29 }
0x14e7   :  { %1316 = vrot.lane.b32.xlu0 %v1311_v32, %s1904_s29 }
0x1558   :  { %v1315_v39 = vpop.permute.xlu1 %1314 }
0x1559   :  { %v1317_v40 = vpop.permute.xlu0 %1316  ;;  %v1320_v41 = vadd.f32 %v1315_v39, %v1300_v35 }
0x155a   :  { %v1321_v42 = vadd.f32 %v1317_v40, %v1301_v36 }
0x155b   :  { %1845 = vtanh.f32 %v1320_v41 }
0x155c   :  { %1847 = vtanh.f32 %v1321_v42  ;;  %v1353_v46 = vrot.slane %v1321_v42, 7 }
0x1565   :  { %v1846_v43 = vpop.eup %1845 }
0x1566   :  { %v1848_v44 = vpop.eup %1847  ;;  %1326 = vrot.lane.b32.xlu1 %v1846_v43, %s1905_s7 }
0x1567   :  { %1328 = vrot.lane.b32.xlu0 %v1848_v44, %s1905_s7 }
0x156a   :  { %295 = vrot.lane.b32.xlu1 %v2027_v54, %s1904_s29  ;;  %v1364_v54 = vld [vmem:[%s2241_s4] sm:$0xff] }
0x156b   :  { %443 = vrot.lane.b32.xlu0 %v2047_v30, %s1904_s29 }
0x156e   :  { %591 = vrot.lane.b32.xlu1 %v2070_v7, %s1904_s29  ;;  %v1367_v7 = vld [vmem:[%s2241_s4 + $0x18] sm:$0xff] }
0x156f   :  { %740 = vrot.lane.b32.xlu0 %v2093_v52, %s1904_s29 }
0x1572   :  { %889 = vrot.lane.b32.xlu1 %v2115_v37, %s1904_s29 }
0x1573   :  { %1038 = vrot.lane.b32.xlu0 %v2137_v17, %s1904_s29 }
0x1576   :  { %1187 = vrot.lane.b32.xlu1 %v1183_v61, %s1904_s29 }
0x1577   :  { %445 = vrot.lane.b32.xlu0 %v2049_v31, %s1904_s29  ;;  %v1366_v31 = vld [vmem:[%s2241_s4 + $0x10] sm:$0xff] }
0x157a   :  { %297 = vrot.lane.b32.xlu1 %v2024_v51, %s1904_s29  ;;  %v1365_v51 = vld [vmem:[%s2241_s4 + $0x8] sm:$0xff]  ;;  %s1906_s4 = smov 96  }
0x157b   :  { %742 = vrot.lane.b32.xlu0 %v2095_v53, %s1904_s29  ;;  %v1703_v30 = vpack.c.bf16 %v1365_v51, %v1364_v54 }
0x157d   :  { %1704 = vmatprep.subr.bf16.mxu1 %v1703_v30 }
0x157e   :  { %593 = vrot.lane.b32.xlu1 %v2072_v9, %s1904_s29  ;;  %1706 = vmatpush3.bf16.msra.mxu1 %v1703_v30  ;;  %v1707_v9 = vpack.c.bf16 %v1367_v7, %v1366_v31 }
0x157f   :  { %1040 = vrot.lane.b32.xlu0 %v2139_v18, %s1904_s29 }
0x1580   :  { %1708 = vmatprep.subr.bf16.mxu1 %v1707_v9 }
0x1582   :  { %891 = vrot.lane.b32.xlu1 %v2117_v38, %s1904_s29  ;;  %1710 = vmatpush3.bf16.msra.mxu1 %v1707_v9 }
0x1586   :  { %1189 = vrot.lane.b32.xlu1 %v2154_v62, %s1904_s29 }
0x15d8   :  { %v1327_v52 = vpop.permute.xlu1 %1326 }
0x15d9   :  { %v1329_v53 = vpop.permute.xlu0 %1328  ;;  %v1332_v37 = vmul.f32 %v1842_v23, %v1327_v52 }
0x15da   :  { %v1333_v38 = vmul.f32 %v1844_v27, %v1329_v53 }
0x15db   :  { %1336 = vrot.lane.b32.xlu0 %v1332_v37, %s1904_s29 }
0x15dc   :  { %v1345_v17 = vrot.slane %v1333_v38, 7  ;;  %v296_v18 = vpop.permute.xlu1 %295 }
0x15dd   :  { %v444_v45 = vpop.permute.xlu0 %443  ;;  %302 = vst.msk [vmem:[#allocation4] sm:$0x1] %vm301_vm5, %v296_v18 }
0x15de   :  { %450 = vst.msk [vmem:[#allocation4] sm:$0x2] %vm449_vm6, %v444_v45  ;;  %1346 = vrot.lane.b32.xlu1 %v1345_v17, %s1904_s29 }
0x15df   :  { %1338 = vrot.lane.b32.xlu0 %v1333_v38, %s1904_s29 }
0x15e0   :  { %v592_v47 = vpop.permute.xlu1 %591 }
0x15e1   :  { %v741_v48 = vpop.permute.xlu0 %740  ;;  %598 = vst.msk [vmem:[#allocation4] sm:$0x4] %vm597_vm7, %v592_v47 }
0x15e2   :  { %747 = vst.msk [vmem:[#allocation4] sm:$0x8] %vm746_vm8, %v741_v48  ;;  %1356 = vrot.lane.b32.xlu1 %v1353_v46, %s1906_s4 }
0x15e3   :  { %1354 = vrot.lane.b32.xlu0 %v1320_v41, %s1906_s4 }
0x15e4   :  { %v890_v49 = vpop.permute.xlu1 %889 }
0x15e5   :  { %v1039_v50 = vpop.permute.xlu0 %1038  ;;  %896 = vst.msk [vmem:[#allocation4] sm:$0x10] %vm895_vm9, %v890_v49 }
0x15e6   :  { %1045 = vst.msk [vmem:[#allocation4] sm:$0x20] %vm1044_vm10, %v1039_v50 }
0x15e8   :  { %v1188_v1 = vpop.permute.xlu1 %1187 }
0x15e9   :  { %v446_v0 = vpop.permute.xlu0 %445  ;;  %1194 = vst.msk [vmem:[#allocation4] sm:$0x40] %vm1193_vm11, %v1188_v1 }
0x15ea   :  { %451 = vst.msk [vmem:[#allocation4 + $0x8] sm:$0x2] %vm449_vm6, %v446_v0 }
0x15ec   :  { %v298_v8 = vpop.permute.xlu1 %297 }
0x15ed   :  { %v743_v13 = vpop.permute.xlu0 %742  ;;  %303 = vst.msk [vmem:[#allocation4 + $0x8] sm:$0x1] %vm301_vm5, %v298_v8 }
0x15ee   :  { %748 = vst.msk [vmem:[#allocation4 + $0x8] sm:$0x8] %vm746_vm8, %v743_v13 }
0x15f0   :  { %v594_v55 = vpop.permute.xlu1 %593 }
0x15f1   :  { %v1041_v56 = vpop.permute.xlu0 %1040  ;;  %599 = vst.msk [vmem:[#allocation4 + $0x8] sm:$0x4] %vm597_vm7, %v594_v55 }
0x15f2   :  { %1046 = vst.msk [vmem:[#allocation4 + $0x8] sm:$0x20] %vm1044_vm10, %v1041_v56 }
0x15f4   :  { %v892_v57 = vpop.permute.xlu1 %891 }
0x15f5   :  { %897 = vst.msk [vmem:[#allocation4 + $0x8] sm:$0x10] %vm895_vm9, %v892_v57 }
0x15f8   :  { %v1190_v58 = vpop.permute.xlu1 %1189 }
0x15f9   :  { %1195 = vst.msk [vmem:[#allocation4 + $0x8] sm:$0x40] %vm1193_vm11, %v1190_v58 }
0x164d   :  { %v1337_v59 = vpop.permute.xlu0 %1336 }
0x164e   :  { %1343 = vst.msk [vmem:[#allocation4] sm:$0x80] %vm1342_vm12, %v1337_v59  ;;  %1349 = vst.msk [vmem:[#allocation2 - $0x7] sm:$0x80] %vm1342_vm12, %v1337_v59 }
0x1650   :  { %v1347_v60 = vpop.permute.xlu1 %1346 }
0x1651   :  { %1350 = vst.msk [vmem:[#allocation2 + $0x1] sm:$0x1] %vm301_vm5, %v1347_v60  ;;  %v1339_v61 = vpop.permute.xlu0 %1338 }
0x1652   :  { %1344 = vst.msk [vmem:[#allocation4 + $0x8] sm:$0x80] %vm1342_vm12, %v1339_v61 }
0x1654   :  { %v1357_v62 = vpop.permute.xlu1 %1356 }
0x1655   :  { %1361 = vst.msk [vmem:[#allocation3 + $0x1] sm:$0x1] %vm301_vm5, %v1357_v62  ;;  %v1355_v63 = vpop.permute.xlu0 %1354  ;;  %v1362_v2 = vld [vmem:[#allocation4] sm:$0xff] }
0x1656   :  { %1360 = vst.msk [vmem:[#allocation3 - $0x7] sm:$0x80] %vm1342_vm12, %v1355_v63  ;;  %1648 = vmatprep.mubr.msk.f32.mxu1 %vm157_vm3, %v1362_v2 }
0x1659   :  { %v1363_v3 = vld [vmem:[#allocation4 + $0x8] sm:$0xff] }
0x165a   :  { %1649 = vmatmul.mubr.msk.f32.vlgmr.msra.gmra.mrb[8].mxu1 %vm157_vm3, %v1363_v3 }
0x172d   :  { %v1650_v5 = vpop.f32.mrb[8].mxu1 }
0x172e   :  { %v1453_v6 = vadd.f32 %v1650_v5, %v1492_v4  ;;  %v1447_v10 = vpop.f32.mrb[9].mxu1 }
0x172f   :  { %v1448_v11 = vadd.f32 %v1492_v4, %v1447_v10 }
0x1730   :  { %1458 = vst.msk [vmem:[%s2243_s6 + $0x8] sm:$0xff] %vm1456_vm13, %v1453_v6 }
0x1731   :  { %1457 = vst.msk [vmem:[%s2243_s6] sm:$0xff] %vm1456_vm13, %v1448_v11 }
0x1732   :  { %1463 = vsyncpa [#allocation6], 1 }
0x1733   :  { %1464 = vsyncpa [#allocation8], 1 }

</bundles_post_ra>
